<compile_context>
chip_gen: v6e
topology: v6e:2x2x1
jax: 0.10.0
libtpu: 0.0.40
codegen_flags: <defaults>
</compile_context>

<pallas_src>
import functools

import jax
import jax.numpy as jnp
import numpy as np
from jax import lax
from jax.experimental import pallas as pl
from jax.experimental.pallas import tpu as pltpu

NUM_GROUPS = 32
EPS = 1e-6


# --------------------------------------------------------------------------
# helpers
# --------------------------------------------------------------------------
def _tpu_vmem_capacity():
    try:
        return int(pltpu.get_tpu_info().vmem_capacity_bytes)
    except Exception:
        return 64 * 1024 * 1024          # conservative: v7x per-core VMEM


def _vmem_ceiling(cap):
    # leave headroom for compiler-internal scratch; never clamp to the full
    # physical VMEM (v7x: 64 MiB), never halve the 128 MiB parts needlessly.
    return max(cap - 16 * 1024 * 1024, (3 * cap) // 4)


def _vmem_limit(needed_bytes, ceiling):
    return int(min(max(needed_bytes + (4 << 20), 32 << 20), ceiling))


def _pick_tile(n, target):
    """Largest multiple of 128 that divides n and is <= target, else n."""
    target = min(target, n)
    t = (target // 128) * 128
    while t >= 128:
        if n % t == 0:
            return t
        t -= 128
    # TODO(synk): non-128-multiple N falls back to a single full-axis tile;
    # very large irregular N would need padding / masked tiles instead.
    return n


# --------------------------------------------------------------------------
# Pass 0: GroupNorm statistics (single HBM read, streaming Chan/Welford)
# --------------------------------------------------------------------------
def _gn_stats_kernel(x_ref, stats_ref, mean_sc, m2_sc):
    i = pl.program_id(1)
    tile_n = x_ref.shape[-1]

    @pl.when(i == 0)
    def _():
        mean_sc[...] = jnp.zeros_like(mean_sc)
        m2_sc[...] = jnp.zeros_like(m2_sc)

    x = x_ref[0]                                     # (C, TN) f32, channel-major
    m_t = jnp.mean(x, axis=-1, keepdims=True)        # per-channel tile mean
    d = x - m_t
    m2_t = jnp.sum(d * d, axis=-1, keepdims=True)    # per-channel centered M2

    # exact streaming combine (no E[x^2]-mean^2 cancellation)
    n_b = float(tile_n)
    n_a = (i * tile_n).astype(jnp.float32)
    n_ab = n_a + n_b
    delta = m_t - mean_sc[...]
    mean_sc[...] = mean_sc[...] + delta * (n_b / n_ab)
    m2_sc[...] = m2_sc[...] + m2_t + (delta * delta) * (n_a * (n_b / n_ab))

    @pl.when(i == pl.num_programs(1) - 1)
    def _():
        stats_ref[0, :, 0:1] = mean_sc[...]
        stats_ref[0, :, 1:2] = m2_sc[...]


# --------------------------------------------------------------------------
# Pass 1: GroupNorm-apply + fused QKV projection (native channel-major input)
# --------------------------------------------------------------------------
def _gn_qkv_kernel(x_ref, a_ref, b_ref, wqv_ref, bqv_ref, wk_ref, bk_ref,
                   qv_ref, kt_ref):
    x_cm = x_ref[0]                              # (C, TN) f32, channel-major
    h_cm = x_cm * a_ref[0] + b_ref[0]            # GN affine (per-channel a, b)
    h16_cm = h_cm.astype(jnp.bfloat16)

    # K, channel-major (C_out, TN): exactly the layout pass 2's score matmul
    # wants, so no per-KV-step transpose in the hot loop.
    k_cm = jnp.dot(wk_ref[...], h16_cm, preferred_element_type=jnp.float32)
    kt_ref[0] = (k_cm + bk_ref[...]).astype(kt_ref.dtype)

    # fused [q|v], channels-last: one XLU transpose per N-tile (amortized),
    # softmax scale pre-folded into the q weights/bias.
    h16 = h_cm.T.astype(jnp.bfloat16)            # (TN, C)
    qv = jnp.dot(h16, wqv_ref[...], preferred_element_type=jnp.float32)
    qv_ref[0] = (qv + bqv_ref[...]).astype(qv_ref.dtype)


# --------------------------------------------------------------------------
# Pass 2: flash attention (online softmax) + out projection + residual,
#         output written channel-major so no wrapper transpose is needed.
# --------------------------------------------------------------------------
def _flash_attn_kernel(x_ref, q_ref, kt_ref, v_ref, wp_ref, bp_ref, o_ref,
                       m_sc, l_sc, acc_sc, *, tkv, kv_resident):
    ki = pl.program_id(2)

    @pl.when(ki == 0)
    def _():
        m_sc[...] = jnp.full(m_sc.shape, -jnp.inf, dtype=m_sc.dtype)
        l_sc[...] = jnp.zeros_like(l_sc)
        acc_sc[...] = jnp.zeros_like(acc_sc)

    if kv_resident:
        # K/V live in VMEM for the whole batch; slice the current KV tile.
        start = pl.multiple_of(ki * tkv, tkv)
        k_cm = kt_ref[0, :, pl.ds(start, tkv)]       # (C, TKV)  bf16
        v = v_ref[0, pl.ds(start, tkv), :]           # (TKV, C)  bf16
    else:
        k_cm = kt_ref[0]
        v = v_ref[0]

    q = q_ref[0]                                     # (TQ, C) bf16, pre-scaled
    s = jnp.dot(q, k_cm, preferred_element_type=jnp.float32)     # (TQ, TKV)

    m_prev = m_sc[...]
    m_new = jnp.maximum(m_prev, jnp.max(s, axis=-1, keepdims=True))
    alpha = jnp.exp(m_prev - m_new)
    p = jnp.exp(s - m_new)
    l_sc[...] = alpha * l_sc[...] + jnp.sum(p, axis=-1, keepdims=True)
    acc_sc[...] = alpha * acc_sc[...] + jnp.dot(
        p.astype(jnp.bfloat16), v, preferred_element_type=jnp.float32)
    m_sc[...] = m_new

    @pl.when(ki == pl.num_programs(2) - 1)
    def _():
        o = acc_sc[...] * pl.reciprocal(l_sc[...], approx=True)   # (TQ, C), EUP
        o16_t = o.T.astype(jnp.bfloat16)                          # (C, TQ)
        proj_cm = jnp.dot(wp_ref[...], o16_t,
                          preferred_element_type=jnp.float32)     # (C_out, TQ)
        o_ref[0] = (x_ref[0] + proj_cm + bp_ref[...]).astype(o_ref.dtype)


# --------------------------------------------------------------------------
# Wrapper
# --------------------------------------------------------------------------
def attn_block_pallas(x_ncthw, params, *, tn=512, tq=256, tkv=512,
                      kv_resident=None):
    """x_ncthw: (B, C, T, H, W) float32. Returns same shape/dtype."""
    B, C, T, H, W = x_ncthw.shape
    N = T * H * W
    assert C % NUM_GROUPS == 0
    cg = C // NUM_GROUPS

    vmem_cap = _tpu_vmem_capacity()
    ceiling = _vmem_ceiling(vmem_cap)

    tn = _pick_tile(N, tn)
    tq = _pick_tile(N, tq)
    tkv = _pick_tile(N, tkv)
    # keep both v7x TensorCores fed: need >= 2 parallel (b, qi) work units
    while B * (N // tq) < 2 and tq > 128:
        smaller = _pick_tile(N, tq // 2)
        if smaller == tq:
            break
        tq = smaller

    # Native layout: (B, C, T, H, W) -> (B, C, N) is a free reshape.
    x_bcn = x_ncthw.reshape(B, C, N).astype(jnp.float32)

    # ---- pass 0: GroupNorm stats (one HBM read of x) ------------------------
    stats_bytes = 2 * (C * tn * 4 + C * 2 * 4) + 2 * C * 4
    stats = pl.pallas_call(
        _gn_stats_kernel,
        out_shape=jax.ShapeDtypeStruct((B, C, 2), jnp.float32),
        grid_spec=pltpu.PrefetchScalarGridSpec(
            num_scalar_prefetch=0,
            grid=(B, N // tn),
            in_specs=[pl.BlockSpec((1, C, tn), lambda b, i: (b, 0, i))],
            out_specs=pl.BlockSpec((1, C, 2), lambda b, i: (b, 0, 0)),
            scratch_shapes=[pltpu.VMEM((C, 1), jnp.float32),
                            pltpu.VMEM((C, 1), jnp.float32)],
        ),
        compiler_params=pltpu.CompilerParams(
            dimension_semantics=("parallel", "arbitrary"),
            vmem_limit_bytes=_vmem_limit(stats_bytes, ceiling)),
    )(x_bcn)

    # tiny per-group combine (Chan pooled variance) + affine coefficients
    mean_c = stats[:, :, 0]                                   # (B, C)
    m2_c = stats[:, :, 1]
    mean_cg = mean_c.reshape(B, NUM_GROUPS, cg)
    m2_cg = m2_c.reshape(B, NUM_GROUPS, cg)
    mean_g = jnp.mean(mean_cg, axis=-1)                       # (B, G)
    m2_g = jnp.sum(m2_cg, axis=-1) + float(N) * jnp.sum(
        jnp.square(mean_cg - mean_g[..., None]), axis=-1)
    var_g = m2_g / float(N * cg)
    inv_g = lax.rsqrt(var_g + EPS)

    gamma = params["gamma"].reshape(1, C).astype(jnp.float32)
    beta = params["beta"].reshape(1, C).astype(jnp.float32)
    inv_ch = jnp.repeat(inv_g, cg, axis=1)                    # (B, C)
    mean_ch = jnp.repeat(mean_g, cg, axis=1)
    gn_a = (inv_ch * gamma).reshape(B, C, 1)
    gn_b = (beta - mean_ch * inv_ch * gamma).reshape(B, C, 1)

    # weights: [q (scale-folded) | v] channels-last, K and proj channel-major
    scale = float(C) ** -0.5
    w_qv = jnp.concatenate([params["wq"].T * scale, params["wv"].T],
                           axis=1).astype(jnp.bfloat16)       # (C, 2C)
    b_qv = jnp.concatenate([params["bq"] * scale, params["bv"]]
                           ).reshape(1, 2 * C).astype(jnp.float32)
    w_k = params["wk"].astype(jnp.bfloat16)                   # (C_out, C_in)
    b_k = params["bk"].reshape(C, 1).astype(jnp.float32)
    w_p = params["wp"].astype(jnp.bfloat16)                   # (C_out, C_in)
    b_p = params["bp"].reshape(C, 1).astype(jnp.float32)

    # ---- pass 1: GN-apply + fused QKV projection, grid (B, N//TN) -----------
    pass1_bytes = 2 * (C * tn * 4 + 2 * C * 4 + C * 2 * C * 2 + 2 * C * 4
                       + C * C * 2 + C * 4 + tn * 2 * C * 2 + C * tn * 2)
    qv, kt = pl.pallas_call(
        _gn_qkv_kernel,
        out_shape=(jax.ShapeDtypeStruct((B, N, 2 * C), jnp.bfloat16),
                   jax.ShapeDtypeStruct((B, C, N), jnp.bfloat16)),
        grid_spec=pltpu.PrefetchScalarGridSpec(
            num_scalar_prefetch=0,
            grid=(B, N // tn),
            in_specs=[
                pl.BlockSpec((1, C, tn), lambda b, i: (b, 0, i)),    # x (native)
                pl.BlockSpec((1, C, 1), lambda b, i: (b, 0, 0)),     # GN scale
                pl.BlockSpec((1, C, 1), lambda b, i: (b, 0, 0)),     # GN shift
                pl.BlockSpec((C, 2 * C), lambda b, i: (0, 0)),       # W_[q|v]
                pl.BlockSpec((1, 2 * C), lambda b, i: (0, 0)),       # b_[q|v]
                pl.BlockSpec((C, C), lambda b, i: (0, 0)),           # W_k
                pl.BlockSpec((C, 1), lambda b, i: (0, 0)),           # b_k
            ],
            out_specs=[
                pl.BlockSpec((1, tn, 2 * C), lambda b, i: (b, i, 0)),  # [q|v]
                pl.BlockSpec((1, C, tn), lambda b, i: (b, 0, i)),      # K (C-major)
            ],
        ),
        compiler_params=pltpu.CompilerParams(
            dimension_semantics=("parallel", "parallel"),
            vmem_limit_bytes=_vmem_limit(pass1_bytes, ceiling)),
    )(x_bcn, gn_a, gn_b, w_qv, b_qv, w_k, b_k)

    # ---- pass 2: flash attention + out projection + residual ----------------
    def pass2_bytes(kv_n):
        return (2 * (C * tq * 4 + tq * C * 2 + C * kv_n * 2 + kv_n * C * 2
                     + C * C * 2 + C * 4 + C * tq * 4)
                + 2 * tq * 4 + tq * C * 4)

    if kv_resident is None:
        kv_resident = pass2_bytes(N) + (4 << 20) <= ceiling
    flash_bytes = pass2_bytes(N if kv_resident else tkv)

    if kv_resident:
        # K/V fetched once per batch (constant index maps), sliced in-kernel.
        kt_spec = pl.BlockSpec((1, C, N), lambda b, qi, ki: (b, 0, 0))
        v_spec = pl.BlockSpec((1, N, C), lambda b, qi, ki: (b, 0, 1))
    else:
        kt_spec = pl.BlockSpec((1, C, tkv), lambda b, qi, ki: (b, 0, ki))
        v_spec = pl.BlockSpec((1, tkv, C), lambda b, qi, ki: (b, ki, 1))

    flash = functools.partial(_flash_attn_kernel, tkv=tkv,
                              kv_resident=kv_resident)
    out_bcn = pl.pallas_call(
        flash,
        out_shape=jax.ShapeDtypeStruct((B, C, N), jnp.float32),
        grid_spec=pltpu.PrefetchScalarGridSpec(
            num_scalar_prefetch=0,
            grid=(B, N // tq, N // tkv),
            in_specs=[
                pl.BlockSpec((1, C, tq), lambda b, qi, ki: (b, 0, qi)),  # x resid
                pl.BlockSpec((1, tq, C), lambda b, qi, ki: (b, qi, 0)),  # q view
                kt_spec,                                                  # K (C-major)
                v_spec,                                                   # v view
                pl.BlockSpec((C, C), lambda b, qi, ki: (0, 0)),           # W_p
                pl.BlockSpec((C, 1), lambda b, qi, ki: (0, 0)),           # b_p
            ],
            out_specs=pl.BlockSpec((1, C, tq), lambda b, qi, ki: (b, 0, qi)),
            scratch_shapes=[
                pltpu.VMEM((tq, 1), jnp.float32),   # m   running max
                pltpu.VMEM((tq, 1), jnp.float32),   # l   running denominator
                pltpu.VMEM((tq, C), jnp.float32),   # acc running numerator
            ],
        ),
        compiler_params=pltpu.CompilerParams(
            dimension_semantics=("parallel", "parallel", "arbitrary"),
            vmem_limit_bytes=_vmem_limit(flash_bytes, ceiling)),
    )(x_bcn, qv, kt, qv, w_p, b_p)

    # (B, C, N) -> (B, C, T, H, W): free reshape, no transpose.
    return out_bcn.reshape(B, C, T, H, W)


# --------------------------------------------------------------------------
# Pure-JAX reference mirroring the PyTorch AttnBlock forward
# --------------------------------------------------------------------------
def attn_block_ref(x_ncthw, params):
    B, C, T, H, W = x_ncthw.shape
    N = T * H * W
    cg = C // NUM_GROUPS
    x = x_ncthw

    xg = x.reshape(B, NUM_GROUPS, cg, N)
    mean = jnp.mean(xg, axis=(2, 3), keepdims=True)
    var = jnp.mean((xg - mean) ** 2, axis=(2, 3), keepdims=True)
    hn = ((xg - mean) / jnp.sqrt(var + EPS)).reshape(B, C, T, H, W)
    hn = hn * params["gamma"].reshape(1, C, 1, 1, 1) + params["beta"].reshape(1, C, 1, 1, 1)

    def conv1(h, w, b):
        return jnp.einsum("oc,bcthw->bothw", w, h) + b.reshape(1, C, 1, 1, 1)

    q = conv1(hn, params["wq"], params["bq"]).reshape(B, C, N)
    k = conv1(hn, params["wk"], params["bk"]).reshape(B, C, N)
    v = conv1(hn, params["wv"], params["bv"]).reshape(B, C, N)

    qT = jnp.transpose(q, (0, 2, 1))
    w_ = jnp.einsum("bnc,bcm->bnm", qT, k) * (int(C) ** (-0.5))
    w_ = jax.nn.softmax(w_, axis=2)
    h_ = jnp.einsum("bcm,bnm->bcn", v, w_).reshape(B, C, T, H, W)
    h_ = conv1(h_, params["wp"], params["bp"])
    return x + h_


def make_params(key, C):
    ks = jax.random.split(key, 8)
    s = 0.05
    return {
        "gamma": 1.0 + s * jax.random.normal(ks[0], (C,), jnp.float32),
        "beta": s * jax.random.normal(ks[1], (C,), jnp.float32),
        "wq": s * jax.random.normal(ks[2], (C, C), jnp.float32),
        "bq": s * jax.random.normal(ks[3], (C,), jnp.float32),
        "wk": s * jax.random.normal(ks[4], (C, C), jnp.float32),
        "bk": s * jax.random.normal(ks[5], (C,), jnp.float32),
        "wv": s * jax.random.normal(ks[6], (C, C), jnp.float32),
        "bv": s * jax.random.normal(ks[7], (C,), jnp.float32),
        "wp": s * jax.random.normal(jax.random.fold_in(key, 100), (C, C), jnp.float32),
        "bp": s * jax.random.normal(jax.random.fold_in(key, 101), (C,), jnp.float32),
    }


if __name__ == "__main__":
    key = jax.random.PRNGKey(0)
    # C divisible by 32 (GroupNorm) and lane-aligned; N = 1024 -> 4 query
    # tiles x 2 KV tiles, exercising the online-softmax accumulation.
    B, C, T, H, W = 2, 128, 4, 16, 16
    kx, kp = jax.random.split(key)
    x = jax.random.normal(kx, (B, C, T, H, W), jnp.float32)
    params = make_params(kp, C)

    ref = jax.block_until_ready(attn_block_ref(x, params))

    # auto path (resident KV at this size) ...
    out = jax.block_until_ready(attn_block_pallas(x, params))
    np.testing.assert_allclose(np.asarray(out), np.asarray(ref), rtol=2e-2, atol=2e-2)

    # ... and force the HBM-tiled KV fallback so both branches stay verified.
    out_tiled = jax.block_until_ready(attn_block_pallas(x, params, kv_resident=False))
    np.testing.assert_allclose(np.asarray(out_tiled), np.asarray(ref), rtol=2e-2, atol=2e-2)

    print("KERNEL_OK")
</pallas_src>

<mosaic_0001>
module attributes {stable_mosaic.version = 11 : i64} {
  func.func @_gn_stats_kernel(%arg0: i32, %arg1: i32, %arg2: memref<1x128x512xf32, #tpu.memory_space<vmem>>, %arg3: memref<1x128x2xf32, #tpu.memory_space<vmem>>, %arg4: memref<128x1xf32, #tpu.memory_space<vmem>>, %arg5: memref<128x1xf32, #tpu.memory_space<vmem>>) attributes {dimension_semantics = [#tpu.dimension_semantics<parallel>, #tpu.dimension_semantics<arbitrary>], iteration_bounds = array<i64: 2, 2>, scalar_prefetch = 0 : i64, scratch_operands = 2 : i64, tpu.core_type = #tpu.core_type<tc>, window_params = [{transform_indices = @transform_0, window_bounds = array<i64: 1, 128, 512>}, {transform_indices = @transform_1, window_bounds = array<i64: 1, 128, 2>}]} {
    %c0_i32 = arith.constant 0 : i32
    %0 = arith.cmpi eq, %arg1, %c0_i32 : i32
    %1 = arith.extui %0 : i1 to i32
    %c0_i32_0 = arith.constant 0 : i32
    %2 = arith.cmpi ne, %1, %c0_i32_0 : i32
    scf.if %2 {
      %cst_19 = arith.constant 0.000000e+00 : f32
      %37 = vector.broadcast %cst_19 : f32 to vector<128x1xf32>
      %c0_20 = arith.constant 0 : index
      %c0_21 = arith.constant 0 : index
      %38 = vector.load %arg4[%c0_20, %c0_21] : memref<128x1xf32, #tpu.memory_space<vmem>>, vector<128x1xf32>
      tpu.vector_store %arg4[%c0_20, %c0_21], %37 {strides = array<i32>} : memref<128x1xf32, #tpu.memory_space<vmem>>, vector<128x1xf32>,
      %cst_22 = arith.constant 0.000000e+00 : f32
      %39 = vector.broadcast %cst_22 : f32 to vector<128x1xf32>
      %c0_23 = arith.constant 0 : index
      %c0_24 = arith.constant 0 : index
      %40 = vector.load %arg5[%c0_23, %c0_24] : memref<128x1xf32, #tpu.memory_space<vmem>>, vector<128x1xf32>
      tpu.vector_store %arg5[%c0_23, %c0_24], %39 {strides = array<i32>} : memref<128x1xf32, #tpu.memory_space<vmem>>, vector<128x1xf32>,
    } else {
    }
    %c0 = arith.constant 0 : index
    %c0_1 = arith.constant 0 : index
    %c0_2 = arith.constant 0 : index
    %3 = vector.load %arg2[%c0, %c0_1, %c0_2] : memref<1x128x512xf32, #tpu.memory_space<vmem>>, vector<1x128x512xf32>
    %4 = vector.shape_cast %3 : vector<1x128x512xf32> to vector<128x512xf32>
    %cst = arith.constant dense<0.000000e+00> : vector<128xf32>
    %5 = vector.multi_reduction <add>, %4, %cst [1] : vector<128x512xf32> to vector<128xf32>
    %6 = vector.shape_cast %5 : vector<128xf32> to vector<128x1xf32>
    %cst_3 = arith.constant 5.120000e+02 : f32
    %7 = vector.broadcast %cst_3 : f32 to vector<128x1xf32>
    %8 = arith.divf %6, %7 : vector<128x1xf32>
    %9 = vector.broadcast %8 : vector<128x1xf32> to vector<128x512xf32>
    %10 = arith.subf %4, %9 : vector<128x512xf32>
    %11 = arith.mulf %10, %10 : vector<128x512xf32>
    %cst_4 = arith.constant dense<0.000000e+00> : vector<128xf32>
    %12 = vector.multi_reduction <add>, %11, %cst_4 [1] : vector<128x512xf32> to vector<128xf32>
    %13 = vector.shape_cast %12 : vector<128xf32> to vector<128x1xf32>
    %c512_i32 = arith.constant 512 : i32
    %14 = arith.muli %arg1, %c512_i32 : i32
    %15 = arith.sitofp %14 : i32 to f32
    %cst_5 = arith.constant 5.120000e+02 : f32
    %16 = arith.addf %15, %cst_5 : f32
    %c0_6 = arith.constant 0 : index
    %c0_7 = arith.constant 0 : index
    %17 = vector.load %arg4[%c0_6, %c0_7] : memref<128x1xf32, #tpu.memory_space<vmem>>, vector<128x1xf32>
    %18 = arith.subf %8, %17 : vector<128x1xf32>
    %c0_8 = arith.constant 0 : index
    %c0_9 = arith.constant 0 : index
    %19 = vector.load %arg4[%c0_8, %c0_9] : memref<128x1xf32, #tpu.memory_space<vmem>>, vector<128x1xf32>
    %cst_10 = arith.constant 5.120000e+02 : f32
    %20 = arith.divf %cst_10, %16 : f32
    %21 = vector.broadcast %20 : f32 to vector<128x1xf32>
    %22 = arith.mulf %18, %21 : vector<128x1xf32>
    %23 = arith.addf %19, %22 : vector<128x1xf32>
    %c0_11 = arith.constant 0 : index
    %c0_12 = arith.constant 0 : index
    %24 = vector.load %arg4[%c0_11, %c0_12] : memref<128x1xf32, #tpu.memory_space<vmem>>, vector<128x1xf32>
    tpu.vector_store %arg4[%c0_11, %c0_12], %23 {strides = array<i32>} : memref<128x1xf32, #tpu.memory_space<vmem>>, vector<128x1xf32>,
    %c0_13 = arith.constant 0 : index
    %c0_14 = arith.constant 0 : index
    %25 = vector.load %arg5[%c0_13, %c0_14] : memref<128x1xf32, #tpu.memory_space<vmem>>, vector<128x1xf32>
    %26 = arith.addf %25, %13 : vector<128x1xf32>
    %27 = arith.mulf %18, %18 : vector<128x1xf32>
    %cst_15 = arith.constant 5.120000e+02 : f32
    %28 = arith.divf %cst_15, %16 : f32
    %29 = arith.mulf %15, %28 : f32
    %30 = vector.broadcast %29 : f32 to vector<128x1xf32>
    %31 = arith.mulf %27, %30 : vector<128x1xf32>
    %32 = arith.addf %26, %31 : vector<128x1xf32>
    %c0_16 = arith.constant 0 : index
    %c0_17 = arith.constant 0 : index
    %33 = vector.load %arg5[%c0_16, %c0_17] : memref<128x1xf32, #tpu.memory_space<vmem>>, vector<128x1xf32>
    tpu.vector_store %arg5[%c0_16, %c0_17], %32 {strides = array<i32>} : memref<128x1xf32, #tpu.memory_space<vmem>>, vector<128x1xf32>,
    %c1_i32 = arith.constant 1 : i32
    %34 = arith.cmpi eq, %arg1, %c1_i32 : i32
    %35 = arith.extui %34 : i1 to i32
    %c0_i32_18 = arith.constant 0 : i32
    %36 = arith.cmpi ne, %35, %c0_i32_18 : i32
    scf.if %36 {
      %c0_19 = arith.constant 0 : index
      %c0_20 = arith.constant 0 : index
      %37 = vector.load %arg4[%c0_19, %c0_20] : memref<128x1xf32, #tpu.memory_space<vmem>>, vector<128x1xf32>
      %c0_21 = arith.constant 0 : index
      %c0_22 = arith.constant 0 : index
      %c0_23 = arith.constant 0 : index
      %38 = vector.load %arg3[%c0_21, %c0_22, %c0_23] : memref<1x128x2xf32, #tpu.memory_space<vmem>>, vector<1x128x1xf32>
      %39 = vector.shape_cast %38 : vector<1x128x1xf32> to vector<128x1xf32>
      %40 = vector.shape_cast %37 : vector<128x1xf32> to vector<1x128x1xf32>
      tpu.vector_store %arg3[%c0_21, %c0_22, %c0_23], %40 {strides = array<i32>} : memref<1x128x2xf32, #tpu.memory_space<vmem>>, vector<1x128x1xf32>,
      %c0_24 = arith.constant 0 : index
      %c0_25 = arith.constant 0 : index
      %41 = vector.load %arg5[%c0_24, %c0_25] : memref<128x1xf32, #tpu.memory_space<vmem>>, vector<128x1xf32>
      %c0_26 = arith.constant 0 : index
      %c0_27 = arith.constant 0 : index
      %c1 = arith.constant 1 : index
      %42 = vector.load %arg3[%c0_26, %c0_27, %c1] : memref<1x128x2xf32, #tpu.memory_space<vmem>>, vector<1x128x1xf32>
      %43 = vector.shape_cast %42 : vector<1x128x1xf32> to vector<128x1xf32>
      %44 = vector.shape_cast %41 : vector<128x1xf32> to vector<1x128x1xf32>
      tpu.vector_store %arg3[%c0_26, %c0_27, %c1], %44 {strides = array<i32>} : memref<1x128x2xf32, #tpu.memory_space<vmem>>, vector<1x128x1xf32>,
    } else {
    }
    return
  }
  func.func @transform_0(%arg0: i32, %arg1: i32) -> (i32, i32, i32) {
    %c0_i32 = arith.constant 0 : i32
    %c0_i32_0 = arith.constant 0 : i32
    return %arg0, %c0_i32, %arg1 : i32, i32, i32
  }
  func.func @transform_1(%arg0: i32, %arg1: i32) -> (i32, i32, i32) {
    %c0_i32 = arith.constant 0 : i32
    %c0_i32_0 = arith.constant 0 : i32
    %c0_i32_1 = arith.constant 0 : i32
    return %arg0, %c0_i32, %c0_i32_0 : i32, i32, i32
  }
}

</mosaic_0001>

<bundles_post_ra>
// kernel: tpu_custom_call.1
= control target key start
LH: loop header
LB: loop body
LE: loop exit
PB: predicated region body
PF: predicated region fallthrough
CT: control target
= control target key end

     0   :  { %6 = vsyncpa [#allocation5], 0  ;;  %s1963_s0 = inlined_call_operand.hbm [shape: f32[2,128,1024], index: 0, kind: input, shape index: {}]   ;;  %s1964_s1 = inlined_call_operand.vmem [shape: f32[2,128,2], index: 1, kind: output, shape index: {}]  }
   0x1   :  { %8 = vsyncpa [#allocation5 + $0x1], 0  ;;  %s1171_s6 = smov 0   ;;  %s1173_s7 = smov 0  }
   0x2   :  { %s1175_s8 = smov 0   ;;  %s1177_s9 = smov 0  }
   0x3   :  { %s1179_s10 = smov 0   ;;  %s1181_s11 = smov 0  }
   0x4   :  { %s1183_s12 = smov 0   ;;  %s1185_s13 = smov 0  }
   0x5 LB: > { %s961_s14 = sadd.s32 4294967295, %s1153_s13   ;;  %s23_s15 = sadd.s32 1, %s1145_s11  ;;  %s1153_s13 = sphi %s1185_s13, %s14_s13   ;;  %s1149_s12 = sphi %s1183_s12, %s2037_s12   ;;  %s1145_s11 = sphi %s1181_s11, %s2036_s11   ;;  %s1141_s10 = sphi %s1179_s10, %s2035_s10   ;;  %s1137_s9 = sphi %s1177_s9, %s2034_s9   ;;  %s1133_s8 = sphi %s1175_s8, %s2033_s8   ;;  %s1129_s7 = sphi %s1173_s7, %s2032_s7   ;;  %s1125_s6 = sphi %s1171_s6, %s2031_s6  }
   0x6   : > { %p24_p0 = scmp.ge.s32.totalorder %s23_s15, 2  ;;  %s26_s16 = sadd.s32 1, %s1149_s12 }
   0x7   : > { %s35_s17 = sadd.s32 1, %s1133_s8  ;;  %p42_p1 = scmp.ne.s32.totalorder %s1133_s8, %s1129_s7 }
   0x8   : > { %s2039_s15 = smov (%p24_p0, %s23_s15), 0  ;;  %s2041_s16 = smov (!%p24_p0, %s26_s16), %s1149_s12 }
   0x9   : > { %s31_s18 = ssub.s32 %s1145_s11, %s2039_s15  ;;  %p43_p2 = scmp.eq.s32.totalorder %s1153_s13, 0 }
   0xa   : > { %p28_p3 = scmp.ge.s32.totalorder %s2041_s16, 2  ;;  %p48_p4 = scmp.ne.s32.totalorder %s1129_s7, %s1125_s6 }
   0xb   : > { %p1222_p5 = por %p43_p2, %p42_p1  ;;  %p49_p6 = scmp.eq.s32.totalorder %s961_s14, 0 }
   0xc   : > { %s2043_s16 = smov (%p28_p3, %s2041_s16), 0  ;;  %p987_p8 = scmp.lt.s32.totalorder %s1153_s13, 4 }
   0xd   : > { %p1228_p7 = por %p49_p6, %p48_p4  ;;  %s30_s21 = ssub.s32 %s1149_s12, %s2043_s16 }
   0xe   : > { %s32_s22 = sor.u32 %s31_s18, %s30_s21  ;;  %s98_s23 = sand.u32 1, %s1133_s8  }
   0xf   : > { %p33_p9 = scmp.eq.s32.totalorder %s32_s22, 0  ;;  %s965_s24 = sshll.u32 %s98_s23, 9 }
  0x10   : > { %s966_s25 = sshll.u32 %s1145_s11, 2  ;;  %s967_s27 = sshll.u32 %s1149_s12, 7 }
  0x11   : > { %s1238_s26 = scalar_select %p33_p9, %s1133_s8, %s35_s17  }
  0x12   : > { %s108_s28 = sadd.s32 %s967_s27, %s966_s25  ;;  %s102_s29 = scalar_lea.vmem [#allocation4], %s965_s24 }
  0x13   : > { %s111_s30 = sshll.u32 %s102_s29, 4  ;;  %s968_s2 = sshll.u32 %s108_s28, 7  ;;  %s112_s30 = int_to_ptr.vmem [resolvable:$true] %s111_s30 }
  0x14   : > { %s110_s5 = scalar_lea.hbm %s1963_s0, %s968_s2  ;;  %p1248_p10 = pnand %p987_p8, %p1222_p5 }
  0x15   : > { %s99_s14 = scalar_lea.sflag [#allocation5], %s98_s23  ;;  %s1072_s17 = scalar_lea.vmem %s112_s30, 8192 }
  0x16   : > { %p1061_p11 = pneg %p1248_p10  ;;  %p1073_p12 = scmp.ne.s32.totalorder %s112_s30, %s1072_s17 }
  0x17   : > { %s1155_s18 = smov [#allocation4]  }
  0x18   : > { %p1075_p13 = pnand %p1073_p12, %p1061_p11  ;;  %s1077_s21 = sshll.u32 %s1155_s18, 4  ;;  %s1078_s21 = int_to_ptr.vmem [resolvable:$false] %s1077_s21 }
  0x19   : > { %s1079_s22 = scalar_lea.vmem %s1078_s21, 16384  ;;  %p1080_p1 = scmp.lt.s32.totalorder %s112_s30, %s1078_s21 }
  0x1a   : > { %p1076_p0 = pneg %p1075_p13  ;;  %p1081_p2 = scmp.lt.s32.totalorder %s1079_s22, %s1072_s17 }
  0x1c   : > { %p1082_p3 = por %p1081_p2, %p1080_p1 }
  0x1e   : > { %p1083_p4 = pnand %p1082_p3, %p1076_p0 }
  0x20   : > { %1086 = shalt.err (!%p1083_p4)
}
  0x21   : > { %s1156_s19 = smov 1024   ;;  %s1157_s23 = smov 512  }
  0x22   : > { %s1158_s24 = smov 32   ;;  %p969_p5 = scmp.ge.s32.totalorder %s1153_s13, 1 }
  0x23   : > { %986 = dma.hbm_to_vmem [thread:$0]  (!%p1248_p10), %s110_s5, 8192, %s112_s30, %s99_s14, %s1156_s19, %s1157_s23, %s1158_s24  }
  0x24   : > { %p119_p6 = scmp.lt.s32.totalorder %s1153_s13, 5 }
  0x26   : > { %p120_p8 = pnand %p969_p5, %p119_p6 }
  0x28   : > { %123 = sbr.rel (%p120_p8) target bundleno = 561 (0x231), region = 24 }
  0x2d   : > { %s125_s25 = sand.u32 1, %s1129_s7  }
  0x2e   : > { %s970_s27 = sshll.u32 %s125_s25, 9  ;;  %s126_s28 = scalar_lea.sflag [#allocation5], %s125_s25 }
  0x2f   : > { %s1259_s29 = scalar_lea.vmem [#allocation4], %s970_s27 }
  0x30   : > { %1120 = dma.done.wait (%p1228_p7), %s126_s28, 8192  }
  0x31   : > { %1122 = vsyncadd (%p1228_p7), %s126_s28, 4294959104  ;;  %p149_p9 = scmp.lt.s32.totalorder %s1141_s10, 1  ;;  %p973_p10 = scmp.ne.s32.totalorder %s1137_s9, 0 }
  0x33   : > { %s2045_s10 = smov (!%p149_p9, %s1141_s10), 1  ;;  %157 = sbr.rel (%p973_p10) target bundleno = 73 (0x49), region = 32 }
  0x34   : > { %s978_s30 = sshll.u32 %s2045_s10, 7 }
  0x35   : > { %s1270_s4 = scalar_lea.vmem %s1964_s1, %s978_s30 }
  0x38   : > { %vm158_vm0 = vcmask 7168   ;;  %v1159_v0 = vmov 0.0  }
  0x39   : > { %159 = vst.msk [vmem:[#allocation2] sm:$0xff] %vm158_vm0, %v1159_v0  ;;  %160 = vst.msk [vmem:[#allocation2 + $0x8] sm:$0xff] %vm158_vm0, %v1159_v0 }
  0x3a   : > { %161 = vst.msk [vmem:[#allocation2 + $0x10] sm:$0xff] %vm158_vm0, %v1159_v0  ;;  %162 = vst.msk [vmem:[#allocation2 + $0x18] sm:$0xff] %vm158_vm0, %v1159_v0 }
  0x3b   : > { %163 = vst.msk [vmem:[#allocation2 + $0x20] sm:$0xff] %vm158_vm0, %v1159_v0  ;;  %164 = vst.msk [vmem:[#allocation2 + $0x28] sm:$0xff] %vm158_vm0, %v1159_v0 }
  0x3c   : > { %165 = vst.msk [vmem:[#allocation2 + $0x30] sm:$0xff] %vm158_vm0, %v1159_v0  ;;  %166 = vst.msk [vmem:[#allocation2 + $0x38] sm:$0xff] %vm158_vm0, %v1159_v0 }
  0x3d   : > { %167 = vst.msk [vmem:[#allocation2 + $0x40] sm:$0xff] %vm158_vm0, %v1159_v0  ;;  %168 = vst.msk [vmem:[#allocation2 + $0x48] sm:$0xff] %vm158_vm0, %v1159_v0 }
  0x3e   : > { %169 = vst.msk [vmem:[#allocation2 + $0x50] sm:$0xff] %vm158_vm0, %v1159_v0  ;;  %170 = vst.msk [vmem:[#allocation2 + $0x58] sm:$0xff] %vm158_vm0, %v1159_v0 }
  0x3f   : > { %171 = vst.msk [vmem:[#allocation2 + $0x60] sm:$0xff] %vm158_vm0, %v1159_v0  ;;  %172 = vst.msk [vmem:[#allocation2 + $0x68] sm:$0xff] %vm158_vm0, %v1159_v0 }
  0x40   : > { %173 = vst.msk [vmem:[#allocation2 + $0x70] sm:$0xff] %vm158_vm0, %v1159_v0  ;;  %174 = vst.msk [vmem:[#allocation2 + $0x78] sm:$0xff] %vm158_vm0, %v1159_v0 }
  0x41   : > { %175 = vst.msk [vmem:[#allocation3] sm:$0xff] %vm158_vm0, %v1159_v0  ;;  %176 = vst.msk [vmem:[#allocation3 + $0x8] sm:$0xff] %vm158_vm0, %v1159_v0 }
  0x42   : > { %177 = vst.msk [vmem:[#allocation3 + $0x10] sm:$0xff] %vm158_vm0, %v1159_v0  ;;  %178 = vst.msk [vmem:[#allocation3 + $0x18] sm:$0xff] %vm158_vm0, %v1159_v0 }
  0x43   : > { %179 = vst.msk [vmem:[#allocation3 + $0x20] sm:$0xff] %vm158_vm0, %v1159_v0  ;;  %180 = vst.msk [vmem:[#allocation3 + $0x28] sm:$0xff] %vm158_vm0, %v1159_v0 }
  0x44   : > { %181 = vst.msk [vmem:[#allocation3 + $0x30] sm:$0xff] %vm158_vm0, %v1159_v0  ;;  %182 = vst.msk [vmem:[#allocation3 + $0x38] sm:$0xff] %vm158_vm0, %v1159_v0 }
  0x45   : > { %183 = vst.msk [vmem:[#allocation3 + $0x40] sm:$0xff] %vm158_vm0, %v1159_v0  ;;  %184 = vst.msk [vmem:[#allocation3 + $0x48] sm:$0xff] %vm158_vm0, %v1159_v0 }
  0x46   : > { %185 = vst.msk [vmem:[#allocation3 + $0x50] sm:$0xff] %vm158_vm0, %v1159_v0  ;;  %186 = vst.msk [vmem:[#allocation3 + $0x58] sm:$0xff] %vm158_vm0, %v1159_v0 }
  0x47   : > { %187 = vst.msk [vmem:[#allocation3 + $0x60] sm:$0xff] %vm158_vm0, %v1159_v0  ;;  %188 = vst.msk [vmem:[#allocation3 + $0x68] sm:$0xff] %vm158_vm0, %v1159_v0 }
  0x48   : > { %189 = vst.msk [vmem:[#allocation3 + $0x70] sm:$0xff] %vm158_vm0, %v1159_v0  ;;  %190 = vst.msk [vmem:[#allocation3 + $0x78] sm:$0xff] %vm158_vm0, %v1159_v0 }
  0x49 PF: > { %v1306_v1 = vld [vmem:[%s1259_s29 + $0x40] sm:$0xff]  ;;  %v1309_v2 = vld [vmem:[%s1259_s29 + $0x48] sm:$0xff]  ;;  %v1312_v3 = vld [vmem:[%s1259_s29 + $0x50] sm:$0xff]  ;;  %s974_s10 = sshll.u32 %s1137_s9, 9  ;;  %vm632_vm1 = vcmask 7168   ;;  %p975_p7 = scmp.ne.s32.totalorder %s1137_s9, 1 }
  0x4a   : > { %v265_v4 = vadd.f32 %v1309_v2, %v1306_v1  ;;  %v1318_v5 = vld [vmem:[%s1259_s29] sm:$0xff]  ;;  %v1321_v6 = vld [vmem:[%s1259_s29 + $0x8] sm:$0xff]  ;;  %s1323_s20 = scvt.s32.f32 %s974_s10  ;;  %v1326_v7 = vld [vmem:[%s1259_s29 + $0x58] sm:$0xff]  ;;  %s1160_s18 = smov (!%p975_p7), 1  }
  0x4b   : > { %v1329_v8 = vld [vmem:[%s1259_s29 + $0x10] sm:$0xff]  ;;  %v255_v9 = vadd.f32 %v1321_v6, %v1318_v5  ;;  %v1334_v10 = vld [vmem:[%s1259_s29 + $0x60] sm:$0xff]  ;;  %v1338_v12 = vld [vmem:[%s1259_s29 + $0x18] sm:$0xff] }
  0x4c   : > { %v266_v11 = vadd.f32 %v265_v4, %v1312_v3  ;;  %v1341_v13 = vld [vmem:[%s1259_s29 + $0x68] sm:$0xff]  ;;  %v1344_v14 = vld [vmem:[%s1259_s29 + $0x70] sm:$0xff]  ;;  %s562_s5 = sadd.f32 512.0, %s1323_s20  ;;  %v1351_v17 = vld [vmem:[%s1259_s29 + $0x20] sm:$0xff] }
  0x4d   : > { %v256_v15 = vadd.f32 %v255_v9, %v1329_v8  ;;  %v270_v16 = vadd.f32 %v1341_v13, %v1334_v10  ;;  %v1354_v18 = vld [vmem:[%s1259_s29 + $0x28] sm:$0xff]  ;;  %v1357_v19 = vld [vmem:[%s1259_s29 + $0x30] sm:$0xff]  ;;  %v1361_v21 = vld [vmem:[%s1259_s29 + $0x78] sm:$0xff] }
  0x4e   : > { %v267_v20 = vadd.f32 %v266_v11, %v1326_v7  ;;  %v260_v22 = vadd.f32 %v1354_v18, %v1351_v17  ;;  %v1366_v23 = vld [vmem:[%s1259_s29 + $0xa0] sm:$0xff]  ;;  %v1369_v24 = vld [vmem:[%s1259_s29 + $0xa8] sm:$0xff]  ;;  %v595_v25 = vstv %s562_s5  ;;  %v1374_v28 = vld [vmem:[%s1259_s29 + $0x38] sm:$0xff] }
  0x4f   : > { %v257_v26 = vadd.f32 %v256_v15, %v1338_v12  ;;  %v271_v27 = vadd.f32 %v270_v16, %v1344_v14  ;;  %v1377_v29 = vld [vmem:[%s1259_s29 + $0xb0] sm:$0xff]  ;;  %v280_v30 = vadd.f32 %v1369_v24, %v1366_v23  ;;  %v1382_v31 = vld [vmem:[%s1259_s29 + $0x80] sm:$0xff]  ;;  %1057 = vrcp.f32 %v595_v25  ;;  %v1386_v33 = vld [vmem:[%s1259_s29 + $0xb8] sm:$0xff] }
  0x50   : > { %268 = vadd.xlane.f32.xlu1 %v267_v20  ;;  %v261_v32 = vadd.f32 %v260_v22, %v1357_v19  ;;  %v1389_v34 = vld [vmem:[%s1259_s29 + $0x88] sm:$0xff]  ;;  %v1392_v35 = vld [vmem:[%s1259_s29 + $0x90] sm:$0xff]  ;;  %v1399_v39 = vld [vmem:[%s1259_s29 + $0xe0] sm:$0xff] }
  0x51   : > { %258 = vadd.xlane.f32.xlu0 %v257_v26  ;;  %v272_v36 = vadd.f32 %v271_v27, %v1361_v21  ;;  %v281_v37 = vadd.f32 %v280_v30, %v1377_v29  ;;  %v275_v38 = vadd.f32 %v1389_v34, %v1382_v31  ;;  %v1402_v40 = vld [vmem:[%s1259_s29 + $0xe8] sm:$0xff]  ;;  %v1405_v41 = vld [vmem:[%s1259_s29 + $0xf0] sm:$0xff]  ;;  %v1409_v43 = vld [vmem:[%s1259_s29 + $0x98] sm:$0xff] }
  0x52   : > { %v262_v42 = vadd.f32 %v261_v32, %v1374_v28  ;;  %v290_v44 = vadd.f32 %v1402_v40, %v1399_v39  ;;  %v1414_v45 = vld [vmem:[%s1259_s29 + $0xc0] sm:$0xff]  ;;  %v1417_v46 = vld [vmem:[%s1259_s29 + $0xc8] sm:$0xff]  ;;  %v1421_v48 = vld [vmem:[%s1259_s29 + $0xd0] sm:$0xff] }
  0x53   : > { %v276_v47 = vadd.f32 %v275_v38, %v1392_v35  ;;  %v285_v49 = vadd.f32 %v1417_v46, %v1414_v45  ;;  %v1426_v50 = vld [vmem:[%s1259_s29 + $0x120] sm:$0xff]  ;;  %v282_v51 = vadd.f32 %v281_v37, %v1386_v33  ;;  %v1430_v52 = vld [vmem:[%s1259_s29 + $0xf8] sm:$0xff]  ;;  %v1437_v55 = vld [vmem:[%s1259_s29 + $0x128] sm:$0xff] }
  0x54   : > { %273 = vadd.xlane.f32.xlu1 %v272_v36  ;;  %v291_v53 = vadd.f32 %v290_v44, %v1405_v41  ;;  %v1434_v54 = vld [vmem:[%s1259_s29 + $0xd8] sm:$0xff]  ;;  %v1442_v58 = vld [vmem:[%s1259_s29 + $0x130] sm:$0xff]  ;;  %v300_v59 = vadd.f32 %v1437_v55, %v1426_v50  ;;  %v1447_v60 = vld [vmem:[%s1259_s29 + $0x100] sm:$0xff] }
  0x55   : > { %263 = vadd.xlane.f32.xlu0 %v262_v42  ;;  %v277_v56 = vadd.f32 %v276_v47, %v1409_v43  ;;  %v286_v57 = vadd.f32 %v285_v49, %v1421_v48  ;;  %v1450_v61 = vld [vmem:[%s1259_s29 + $0x108] sm:$0xff]  ;;  %v1453_v62 = vld [vmem:[%s1259_s29 + $0x110] sm:$0xff]  ;;  %v1458_v0 = vld [vmem:[%s1259_s29 + $0x160] sm:$0xff] }
  0x56   : > { %v295_v63 = vadd.f32 %v1450_v61, %v1447_v60  ;;  %1989 = vst [vmem:[#allocation7_spill] sm:$0xff] %v1458_v0  ;;  %v1461_v4 = vld [vmem:[%s1259_s29 + $0x168] sm:$0xff]  ;;  %v1464_v9 = vld [vmem:[%s1259_s29 + $0x140] sm:$0xff]  ;;  %v292_v11 = vadd.f32 %v291_v53, %v1430_v52  ;;  %v1468_v15 = vld [vmem:[%s1259_s29 + $0x138] sm:$0xff]  ;;  %v301_v16 = vadd.f32 %v300_v59, %v1442_v58 }
  0x57   : > { %1990 = vst [vmem:[#allocation8_spill] sm:$0xff] %v1461_v4  ;;  %v1472_v20 = vld [vmem:[%s1259_s29 + $0x118] sm:$0xff]  ;;  %v310_v22 = vadd.f32 %v1461_v4, %v1458_v0  ;;  %v1477_v25 = vld [vmem:[%s1259_s29 + $0x148] sm:$0xff]  ;;  %v287_v26 = vadd.f32 %v286_v57, %v1434_v54  ;;  %v1482_v30 = vld [vmem:[%s1259_s29 + $0x170] sm:$0xff] }
  0x58   : > { %283 = vadd.xlane.f32.xlu1 %v282_v51  ;;  %v296_v27 = vadd.f32 %v295_v63, %v1453_v62  ;;  %1991 = vst [vmem:[#allocation9_spill] sm:$0xff] %v1482_v30  ;;  %v305_v32 = vadd.f32 %v1477_v25, %v1464_v9  ;;  %v1487_v36 = vld [vmem:[%s1259_s29 + $0x1a0] sm:$0xff]  ;;  %v1490_v37 = vld [vmem:[%s1259_s29 + $0x1a8] sm:$0xff]  ;;  %v1493_v38 = vld [vmem:[%s1259_s29 + $0x150] sm:$0xff]  ;;  %v302_v49 = vadd.f32 %v301_v16, %v1468_v15 }
  0x59   : > { %278 = vadd.xlane.f32.xlu0 %v277_v56  ;;  %1992 = vst [vmem:[#allocation10_spill] sm:$0xff] %v1487_v36  ;;  %1993 = vst [vmem:[#allocation11_spill] sm:$0xff] %v1490_v37  ;;  %v1496_v42 = vld [vmem:[%s1259_s29 + $0x180] sm:$0xff]  ;;  %v1499_v44 = vld [vmem:[%s1259_s29 + $0x188] sm:$0xff]  ;;  %v311_v53 = vadd.f32 %v310_v22, %v1482_v30  ;;  %v320_v57 = vadd.f32 %v1490_v37, %v1487_v36 }
  0x5a   : > { %1994 = vst [vmem:[#allocation12_spill] sm:$0xff] %v1496_v42  ;;  %1995 = vst [vmem:[#allocation13_spill] sm:$0xff] %v1499_v44  ;;  %v1503_v51 = vld [vmem:[%s1259_s29 + $0x178] sm:$0xff]  ;;  %v297_v59 = vadd.f32 %v296_v27, %v1472_v20  ;;  %v306_v63 = vadd.f32 %v305_v32, %v1493_v38  ;;  %v1514_v4 = vld [vmem:[%s1259_s29 + $0x1b0] sm:$0xff] }
  0x5b   : > { %1996 = vst [vmem:[#allocation14_spill] sm:$0xff] %v1503_v51  ;;  %v1507_v56 = vld [vmem:[%s1259_s29 + $0x158] sm:$0xff]  ;;  %1997 = vst [vmem:[#allocation15_spill] sm:$0xff] %v1514_v4  ;;  %v1519_v16 = vld [vmem:[%s1259_s29 + $0x1e0] sm:$0xff]  ;;  %v312_v32 = vadd.f32 %v311_v53, %v1503_v51  ;;  %v321_v36 = vadd.f32 %v320_v57, %v1514_v4 }
  0x5c   : > { %v1058_v47 = vpop.eup %1057  ;;  %293 = vadd.xlane.f32.xlu1 %v292_v11  ;;  %v315_v11 = vadd.f32 %v1499_v44, %v1496_v42  ;;  %1998 = vst [vmem:[#allocation16_spill] sm:$0xff] %v1519_v16  ;;  %v1522_v22 = vld [vmem:[%s1259_s29 + $0x1e8] sm:$0xff]  ;;  %v1525_v37 = vld [vmem:[%s1259_s29 + $0x190] sm:$0xff]  ;;  %v307_v42 = vadd.f32 %v306_v63, %v1507_v56  ;;  %v1548_v53 = vld [vmem:[%s1259_s29 + $0x198] sm:$0xff] }
  0x5d   : > { %288 = vadd.xlane.f32.xlu0 %v287_v26  ;;  %1999 = vst [vmem:[#allocation17_spill] sm:$0xff] %v1522_v22  ;;  %979 = vpush %v1058_v47  ;;  %v1528_v26 = vld [vmem:[%s1259_s29 + $0x1c0] sm:$0xff]  ;;  %v1531_v27 = vld [vmem:[%s1259_s29 + $0x1c8] sm:$0xff]  ;;  %v330_v44 = vadd.f32 %v1522_v22, %v1519_v16 }
  0x5e   : > { %2000 = vst [vmem:[#allocation18_spill] sm:$0xff] %v1528_v26  ;;  %2001 = vst [vmem:[#allocation19_spill] sm:$0xff] %v1531_v27  ;;  %v1539_v47 = vld [vmem:[%s1259_s29 + $0x1b8] sm:$0xff]  ;;  %v316_v30 = vadd.f32 %v315_v11, %v1525_v37  ;;  %v1543_v0 = vld [vmem:[%s1259_s29 + $0x1f0] sm:$0xff] }
  0x5f   : > { %2002 = vst [vmem:[#allocation20_spill] sm:$0xff] %v1539_v47  ;;  %2003 = vst [vmem:[#allocation21_spill] sm:$0xff] %v1543_v0  ;;  %v1551_v51 = vld [vmem:[%s1259_s29 + $0x1d0] sm:$0xff]  ;;  %v322_v57 = vadd.f32 %v321_v36, %v1539_v47  ;;  %v1557_v22 = vld [vmem:[%s1259_s29 + $0x1f8] sm:$0xff] }
  0x60   : > { %303 = vadd.xlane.f32.xlu1 %v302_v49  ;;  %v325_v49 = vadd.f32 %v1531_v27, %v1528_v26  ;;  %2004 = vst [vmem:[#allocation22_spill] sm:$0xff] %v1551_v51  ;;  %v317_v63 = vadd.f32 %v316_v30, %v1548_v53  ;;  %2005 = vst [vmem:[#allocation23_spill] sm:$0xff] %v1557_v22  ;;  %v1561_v16 = vld [vmem:[%s1259_s29 + $0x1d8] sm:$0xff] }
  0x61   : > { %298 = vadd.xlane.f32.xlu0 %v297_v59  ;;  %v331_v59 = vadd.f32 %v330_v44, %v1543_v0  ;;  %2006 = vst [vmem:[#allocation24_spill] sm:$0xff] %v1561_v16 }
  0x62   : > { %v326_v11 = vadd.f32 %v325_v49, %v1551_v51 }
  0x63   : > { %v332_v27 = vadd.f32 %v331_v59, %v1557_v22 }
  0x64   : > { %313 = vadd.xlane.f32.xlu1 %v312_v32  ;;  %v327_v32 = vadd.f32 %v326_v11, %v1561_v16 }
  0x65   : > { %308 = vadd.xlane.f32.xlu0 %v307_v42 }
  0x68   : > { %323 = vadd.xlane.f32.xlu1 %v322_v57 }
  0x69   : > { %318 = vadd.xlane.f32.xlu0 %v317_v63 }
  0x6c   : > { %333 = vadd.xlane.f32.xlu1 %v332_v27 }
  0x6d   : > { %328 = vadd.xlane.f32.xlu0 %v327_v32 }
  0x8e   : > { %s980_s6 = spop %979 }
  0x8f   : > { %s598_s14 = smul.f32 512.0, %s980_s6 }
  0x91   : > { %s697_s17 = smul.f32 %s598_s14, %s1323_s20  ;;  %v1570_v49 = vstv %s598_s14 }
  0x92   : > { %2008 = vst [vmem:[#allocation26_spill] sm:$0xff] %v1570_v49 }
  0x93   : > { %v1572_v0 = vstv %s697_s17 }
  0x94   : > { %2009 = vst [vmem:[#allocation27_spill] sm:$0xff] %v1572_v0 }
  0xd9   : > { %v269_v36 = vpop.xlane.xlu1 %268 }
  0xda   : > { %v1566_v42 = vmul.f32 0.001953125, %v269_v36  ;;  %v259_v30 = vpop.xlane.xlu0 %258 }
  0xdb   : > { %v1568_v44 = vmul.f32 0.001953125, %v259_v30 }
  0xdc   : > { %2007 = vst [vmem:[#allocation25_spill] sm:$0xff] %v1566_v42  ;;  %v360_v57 = vsub.f32 %v1306_v1, %v1566_v42  ;;  %v361_v27 = vsub.f32 %v1309_v2, %v1566_v42  ;;  %v362_v59 = vsub.f32 %v1312_v3, %v1566_v42  ;;  %v363_v63 = vsub.f32 %v1326_v7, %v1566_v42 }
  0xdd   : > { %v274_v11 = vpop.xlane.xlu1 %273  ;;  %v352_v32 = vsub.f32 %v1318_v5, %v1568_v44  ;;  %v353_v36 = vsub.f32 %v1321_v6, %v1568_v44  ;;  %v354_v30 = vsub.f32 %v1329_v8, %v1568_v44  ;;  %v355_v1 = vsub.f32 %v1338_v12, %v1568_v44 }
  0xde   : > { %v1590_v2 = vmul.f32 0.001953125, %v274_v11  ;;  %v264_v0 = vpop.xlane.xlu0 %263  ;;  %v424_v3 = vmul.f32 %v360_v57, %v360_v57  ;;  %v425_v49 = vmul.f32 %v361_v27, %v361_v27  ;;  %v426_v22 = vmul.f32 %v362_v59, %v362_v59 }
  0xdf   : > { %v1592_v7 = vmul.f32 0.001953125, %v264_v0  ;;  %v416_v42 = vmul.f32 %v352_v32, %v352_v32  ;;  %v417_v16 = vmul.f32 %v353_v36, %v353_v36  ;;  %v418_v5 = vmul.f32 %v354_v30, %v354_v30 }
  0xe0   : > { %v419_v51 = vmul.f32 %v355_v1, %v355_v1  ;;  %v427_v26 = vmul.f32 %v363_v63, %v363_v63  ;;  %v490_v6 = vadd.f32 %v425_v49, %v424_v3  ;;  %v364_v8 = vsub.f32 %v1334_v10, %v1590_v2 }
  0xe1   : > { %v284_v47 = vpop.xlane.xlu1 %283  ;;  %v480_v4 = vadd.f32 %v417_v16, %v416_v42  ;;  %v356_v12 = vsub.f32 %v1351_v17, %v1592_v7  ;;  %v357_v57 = vsub.f32 %v1354_v18, %v1592_v7  ;;  %v358_v0 = vsub.f32 %v1357_v19, %v1592_v7 }
  0xe2   : > { %v1602_v27 = vmul.f32 0.001953125, %v284_v47  ;;  %v279_v59 = vpop.xlane.xlu0 %278  ;;  %v491_v11 = vadd.f32 %v490_v6, %v426_v22  ;;  %v359_v49 = vsub.f32 %v1374_v28, %v1592_v7  ;;  %v365_v10 = vsub.f32 %v1341_v13, %v1590_v2 }
  0xe3   : > { %v1608_v16 = vmul.f32 0.001953125, %v279_v59  ;;  %v481_v42 = vadd.f32 %v480_v4, %v418_v5  ;;  %v420_v17 = vmul.f32 %v356_v12, %v356_v12  ;;  %v421_v63 = vmul.f32 %v357_v57, %v357_v57 }
  0xe4   : > { %v492_v32 = vadd.f32 %v491_v11, %v427_v26  ;;  %v422_v18 = vmul.f32 %v358_v0, %v358_v0  ;;  %v423_v36 = vmul.f32 %v359_v49, %v359_v49  ;;  %v366_v19 = vsub.f32 %v1344_v14, %v1590_v2 }
  0xe5   : > { %v294_v47 = vpop.xlane.xlu1 %293  ;;  %v482_v30 = vadd.f32 %v481_v42, %v419_v51  ;;  %v485_v22 = vadd.f32 %v421_v63, %v420_v17  ;;  %v367_v28 = vsub.f32 %v1361_v21, %v1590_v2  ;;  %v428_v1 = vmul.f32 %v364_v8, %v364_v8 }
  0xe6   : > { %v1614_v3 = vmul.f32 0.001953125, %v294_v47  ;;  %v289_v13 = vpop.xlane.xlu0 %288  ;;  %v429_v6 = vmul.f32 %v365_v10, %v365_v10  ;;  %v430_v4 = vmul.f32 %v366_v19, %v366_v19  ;;  %v368_v26 = vsub.f32 %v1382_v31, %v1608_v16 }
  0xe7   : > { %v1618_v5 = vmul.f32 0.001953125, %v289_v13  ;;  %483 = vadd.xlane.f32.xlu0 %v482_v30  ;;  %v486_v12 = vadd.f32 %v485_v22, %v422_v18  ;;  %v431_v14 = vmul.f32 %v367_v28, %v367_v28  ;;  %v369_v51 = vsub.f32 %v1389_v34, %v1608_v16 }
  0xe8   : > { %v495_v57 = vadd.f32 %v429_v6, %v428_v1  ;;  %v370_v21 = vsub.f32 %v1392_v35, %v1608_v16  ;;  %v371_v8 = vsub.f32 %v1409_v43, %v1608_v16  ;;  %v432_v0 = vmul.f32 %v368_v26, %v368_v26 }
  0xe9   : > { %v304_v59 = vpop.xlane.xlu1 %303  ;;  %v487_v11 = vadd.f32 %v486_v12, %v423_v36  ;;  %v433_v49 = vmul.f32 %v369_v51, %v369_v51  ;;  %v372_v31 = vsub.f32 %v1366_v23, %v1602_v27  ;;  %v373_v10 = vsub.f32 %v1369_v24, %v1602_v27 }
  0xea   : > { %v1630_v42 = vmul.f32 0.001953125, %v304_v59  ;;  %v299_v34 = vpop.xlane.xlu0 %298  ;;  %v496_v17 = vadd.f32 %v495_v57, %v430_v4  ;;  %v434_v63 = vmul.f32 %v370_v21, %v370_v21  ;;  %v435_v18 = vmul.f32 %v371_v8, %v371_v8 }
  0xeb   : > { %v1632_v35 = vmul.f32 0.001953125, %v299_v34  ;;  %493 = vadd.xlane.f32.xlu0 %v492_v32  ;;  %488 = vadd.xlane.f32.xlu1 %v487_v11  ;;  %v500_v43 = vadd.f32 %v433_v49, %v432_v0  ;;  %v374_v36 = vsub.f32 %v1377_v29, %v1602_v27  ;;  %v375_v23 = vsub.f32 %v1386_v33, %v1602_v27 }
  0xec   : > { %v497_v19 = vadd.f32 %v496_v17, %v431_v14  ;;  %v436_v47 = vmul.f32 %v372_v31, %v372_v31  ;;  %v437_v24 = vmul.f32 %v373_v10, %v373_v10  ;;  %v376_v30 = vsub.f32 %v1414_v45, %v1618_v5 }
  0xed   : > { %v314_v22 = vpop.xlane.xlu1 %313  ;;  %v501_v28 = vadd.f32 %v500_v43, %v434_v63  ;;  %v438_v1 = vmul.f32 %v374_v36, %v374_v36  ;;  %v439_v13 = vmul.f32 %v375_v23, %v375_v23  ;;  %v377_v32 = vsub.f32 %v1417_v46, %v1618_v5 }
  0xee   : > { %v1642_v6 = vmul.f32 0.001953125, %v314_v22  ;;  %v309_v4 = vpop.xlane.xlu0 %308  ;;  %v505_v29 = vadd.f32 %v437_v24, %v436_v47  ;;  %v378_v33 = vsub.f32 %v1421_v48, %v1618_v5  ;;  %v379_v26 = vsub.f32 %v1434_v54, %v1618_v5 }
  0xef   : > { %v1648_v12 = vmul.f32 0.001953125, %v309_v4  ;;  %498 = vadd.xlane.f32.xlu1 %v497_v19  ;;  %v502_v45 = vadd.f32 %v501_v28, %v435_v18  ;;  %v440_v14 = vmul.f32 %v376_v30, %v376_v30  ;;  %v441_v51 = vmul.f32 %v377_v32, %v377_v32 }
  0xf0   : > { %v506_v57 = vadd.f32 %v505_v29, %v438_v1  ;;  %v442_v21 = vmul.f32 %v378_v33, %v378_v33  ;;  %v443_v8 = vmul.f32 %v379_v26, %v379_v26  ;;  %v380_v46 = vsub.f32 %v1399_v39, %v1614_v3 }
  0xf1   : > { %503 = vadd.xlane.f32.xlu0 %v502_v45  ;;  %v324_v0 = vpop.xlane.xlu1 %323  ;;  %v510_v59 = vadd.f32 %v441_v51, %v440_v14  ;;  %v381_v48 = vsub.f32 %v1402_v40, %v1614_v3  ;;  %v382_v54 = vsub.f32 %v1405_v41, %v1614_v3  ;;  %v383_v11 = vsub.f32 %v1430_v52, %v1614_v3 }
  0xf2   : > { %v1658_v49 = vmul.f32 0.001953125, %v324_v0  ;;  %v319_v31 = vpop.xlane.xlu0 %318  ;;  %v507_v10 = vadd.f32 %v506_v57, %v439_v13  ;;  %v444_v34 = vmul.f32 %v380_v46, %v380_v46  ;;  %v384_v39 = vsub.f32 %v1447_v60, %v1632_v35 }
  0xf3   : > { %v1662_v17 = vmul.f32 0.001953125, %v319_v31  ;;  %v511_v63 = vadd.f32 %v510_v59, %v442_v21  ;;  %v445_v18 = vmul.f32 %v381_v48, %v381_v48  ;;  %v446_v43 = vmul.f32 %v382_v54, %v382_v54 }
  0xf4   : > { %508 = vadd.xlane.f32.xlu1 %v507_v10  ;;  %v447_v40 = vmul.f32 %v383_v11, %v383_v11  ;;  %v385_v41 = vsub.f32 %v1450_v61, %v1632_v35  ;;  %v386_v52 = vsub.f32 %v1453_v62, %v1632_v35  ;;  %v387_v36 = vsub.f32 %v1472_v20, %v1632_v35 }
  0xf5   : > { %v512_v23 = vadd.f32 %v511_v63, %v443_v8  ;;  %v334_v19 = vpop.xlane.xlu1 %333  ;;  %v515_v47 = vadd.f32 %v445_v18, %v444_v34  ;;  %v448_v60 = vmul.f32 %v384_v39, %v384_v39  ;;  %v388_v24 = vsub.f32 %v1426_v50, %v1630_v42 }
  0xf6   : > { %v1672_v30 = vmul.f32 0.001953125, %v334_v19  ;;  %v329_v22 = vpop.xlane.xlu0 %328  ;;  %v449_v28 = vmul.f32 %v385_v41, %v385_v41  ;;  %v450_v1 = vmul.f32 %v386_v52, %v386_v52  ;;  %v451_v13 = vmul.f32 %v387_v36, %v387_v36  ;;  %v2015_v41 = vld [vmem:[#allocation13_spill] sm:$0xff] }
  0xf7   : > { %513 = vadd.xlane.f32.xlu0 %v512_v23  ;;  %v1674_v61 = vmul.f32 0.001953125, %v329_v22  ;;  %v516_v62 = vadd.f32 %v515_v47, %v446_v43  ;;  %v389_v20 = vsub.f32 %v1437_v55, %v1630_v42  ;;  %v390_v32 = vsub.f32 %v1442_v58, %v1630_v42  ;;  %v2014_v43 = vld [vmem:[#allocation12_spill] sm:$0xff] }
  0xf8   : > { %v520_v4 = vadd.f32 %v449_v28, %v448_v60  ;;  %v391_v50 = vsub.f32 %v1468_v15, %v1630_v42  ;;  %v452_v29 = vmul.f32 %v388_v24, %v388_v24  ;;  %v392_v33 = vsub.f32 %v1464_v9, %v1648_v12  ;;  %v2010_v9 = vld [vmem:[#allocation7_spill] sm:$0xff] }
  0xf9   : > { %v517_v26 = vadd.f32 %v516_v62, %v447_v40  ;;  %v453_v45 = vmul.f32 %v389_v20, %v389_v20  ;;  %v454_v14 = vmul.f32 %v390_v32, %v390_v32  ;;  %v393_v51 = vsub.f32 %v1477_v25, %v1648_v12  ;;  %v2011_v25 = vld [vmem:[#allocation8_spill] sm:$0xff]  ;;  %v2016_v62 = vld [vmem:[#allocation10_spill] sm:$0xff]  ;;  %v2017_v32 = vld [vmem:[#allocation11_spill] sm:$0xff] }
  0xfa   : > { %v521_v57 = vadd.f32 %v520_v4, %v450_v1  ;;  %v455_v21 = vmul.f32 %v391_v50, %v391_v50  ;;  %v394_v55 = vsub.f32 %v1493_v38, %v1648_v12  ;;  %v395_v58 = vsub.f32 %v1507_v56, %v1648_v12  ;;  %v2012_v38 = vld [vmem:[#allocation9_spill] sm:$0xff]  ;;  %v2013_v56 = vld [vmem:[#allocation14_spill] sm:$0xff] }
  0xfb   : > { %518 = vadd.xlane.f32.xlu1 %v517_v26  ;;  %v525_v15 = vadd.f32 %v453_v45, %v452_v29  ;;  %v456_v8 = vmul.f32 %v392_v33, %v392_v33  ;;  %v457_v46 = vmul.f32 %v393_v51, %v393_v51  ;;  %v396_v0 = vsub.f32 %v2010_v9, %v1642_v6  ;;  %v2018_v26 = vld [vmem:[#allocation15_spill] sm:$0xff] }
  0xfc   : > { %v522_v59 = vadd.f32 %v521_v57, %v451_v13  ;;  %v458_v48 = vmul.f32 %v394_v55, %v394_v55  ;;  %v459_v54 = vmul.f32 %v395_v58, %v395_v58  ;;  %v397_v11 = vsub.f32 %v2011_v25, %v1642_v6  ;;  %v2020_v58 = vld [vmem:[#allocation18_spill] sm:$0xff]  ;;  %v2023_v25 = vld [vmem:[#allocation24_spill] sm:$0xff] }
  0xfd   : > { %v526_v31 = vadd.f32 %v525_v15, %v454_v14  ;;  %v530_v10 = vadd.f32 %v457_v46, %v456_v8  ;;  %v398_v34 = vsub.f32 %v2012_v38, %v1642_v6  ;;  %v399_v39 = vsub.f32 %v2013_v56, %v1642_v6  ;;  %v2021_v8 = vld [vmem:[#allocation19_spill] sm:$0xff]  ;;  %v2024_v38 = vld [vmem:[#allocation16_spill] sm:$0xff] }
  0xfe   : > { %523 = vadd.xlane.f32.xlu0 %v522_v59  ;;  %v460_v63 = vmul.f32 %v396_v0, %v396_v0  ;;  %v461_v18 = vmul.f32 %v397_v11, %v397_v11  ;;  %v400_v40 = vsub.f32 %v2014_v43, %v1662_v17  ;;  %v401_v52 = vsub.f32 %v2015_v41, %v1662_v17  ;;  %v563_v56 = vld [vmem:[#allocation2] sm:$0xff]  ;;  %v2025_v43 = vld [vmem:[#allocation17_spill] sm:$0xff]  ;;  %v564_v41 = vld [vmem:[#allocation2 + $0x8] sm:$0xff] }
  0xff   : > { %v527_v36 = vadd.f32 %v526_v31, %v455_v21  ;;  %v531_v23 = vadd.f32 %v530_v10, %v458_v48  ;;  %v462_v19 = vmul.f32 %v398_v34, %v398_v34  ;;  %v463_v47 = vmul.f32 %v399_v39, %v399_v39  ;;  %v2022_v48 = vld [vmem:[#allocation22_spill] sm:$0xff] }
 0x100   : > { %v535_v60 = vadd.f32 %v461_v18, %v460_v63  ;;  %v402_v24 = vsub.f32 %v1525_v37, %v1662_v17  ;;  %v403_v22 = vsub.f32 %v1548_v53, %v1662_v17  ;;  %v464_v28 = vmul.f32 %v400_v40, %v400_v40  ;;  %v2019_v53 = vld [vmem:[#allocation20_spill] sm:$0xff] }
 0x101   : > { %528 = vadd.xlane.f32.xlu1 %v527_v36  ;;  %v532_v1 = vadd.f32 %v531_v23, %v459_v54  ;;  %v465_v13 = vmul.f32 %v401_v52, %v401_v52  ;;  %v404_v20 = vsub.f32 %v2016_v62, %v1658_v49  ;;  %v405_v4 = vsub.f32 %v2017_v32, %v1658_v49  ;;  %v2026_v23 = vld [vmem:[#allocation21_spill] sm:$0xff]  ;;  %v566_v62 = vld [vmem:[#allocation2 + $0x18] sm:$0xff] }
 0x102   : > { %v536_v50 = vadd.f32 %v535_v60, %v462_v19  ;;  %v466_v29 = vmul.f32 %v402_v24, %v402_v24  ;;  %v467_v33 = vmul.f32 %v403_v22, %v403_v22  ;;  %v406_v45 = vsub.f32 %v2018_v26, %v1658_v49  ;;  %v565_v24 = vld [vmem:[#allocation2 + $0x10] sm:$0xff] }
 0x103   : > { %533 = vadd.xlane.f32.xlu0 %v532_v1  ;;  %v540_v37 = vadd.f32 %v465_v13, %v464_v28  ;;  %v407_v14 = vsub.f32 %v2019_v53, %v1658_v49  ;;  %v468_v51 = vmul.f32 %v404_v20, %v404_v20  ;;  %v469_v57 = vmul.f32 %v405_v4, %v405_v4 }
 0x104   : > { %v537_v21 = vadd.f32 %v536_v50, %v463_v47  ;;  %v470_v55 = vmul.f32 %v406_v45, %v406_v45  ;;  %v408_v15 = vsub.f32 %v2020_v58, %v1674_v61  ;;  %v409_v46 = vsub.f32 %v2021_v8, %v1674_v61  ;;  %v2027_v47 = vld [vmem:[#allocation23_spill] sm:$0xff] }
 0x105   : > { %v541_v9 = vadd.f32 %v540_v37, %v466_v29  ;;  %v471_v0 = vmul.f32 %v407_v14, %v407_v14  ;;  %v545_v59 = vadd.f32 %v469_v57, %v468_v51  ;;  %v410_v54 = vsub.f32 %v2022_v48, %v1674_v61  ;;  %v2029_v37 = vld [vmem:[#allocation25_spill] sm:$0xff] }
 0x106   : > { %538 = vadd.xlane.f32.xlu1 %v537_v21  ;;  %v411_v11 = vsub.f32 %v2023_v25, %v1674_v61  ;;  %v472_v31 = vmul.f32 %v408_v15, %v408_v15  ;;  %v473_v10 = vmul.f32 %v409_v46, %v409_v46  ;;  %v412_v34 = vsub.f32 %v2024_v38, %v1672_v30  ;;  %v2030_v15 = vld [vmem:[#allocation27_spill] sm:$0xff]  ;;  %v568_v46 = vld [vmem:[#allocation2 + $0x28] sm:$0xff]  ;;  %v570_v25 = vld [vmem:[#allocation2 + $0x38] sm:$0xff] }
 0x107   : > { %v542_v39 = vadd.f32 %v541_v9, %v467_v33  ;;  %v546_v63 = vadd.f32 %v545_v59, %v470_v55  ;;  %v474_v18 = vmul.f32 %v410_v54, %v410_v54  ;;  %v413_v40 = vsub.f32 %v2025_v43, %v1672_v30  ;;  %v2028_v33 = vld [vmem:[#allocation26_spill] sm:$0xff]  ;;  %v569_v9 = vld [vmem:[#allocation2 + $0x30] sm:$0xff] }
 0x108   : > { %v475_v52 = vmul.f32 %v411_v11, %v411_v11  ;;  %v550_v36 = vadd.f32 %v473_v10, %v472_v31  ;;  %v414_v19 = vsub.f32 %v2026_v23, %v1672_v30  ;;  %v415_v60 = vsub.f32 %v2027_v47, %v1672_v30  ;;  %v573_v23 = vld [vmem:[#allocation2 + $0x50] sm:$0xff] }
 0x109   : > { %543 = vadd.xlane.f32.xlu0 %v542_v39  ;;  %v547_v22 = vadd.f32 %v546_v63, %v471_v0  ;;  %v476_v28 = vmul.f32 %v412_v34, %v412_v34  ;;  %v477_v1 = vmul.f32 %v413_v40, %v413_v40  ;;  %v579_v13 = vsub.f32 %v1568_v44, %v563_v56  ;;  %v567_v44 = vld [vmem:[#allocation2 + $0x20] sm:$0xff] }
 0x10a   : > { %v551_v20 = vadd.f32 %v550_v36, %v474_v18  ;;  %v478_v32 = vmul.f32 %v414_v19, %v414_v19  ;;  %v479_v4 = vmul.f32 %v415_v60, %v415_v60  ;;  %v580_v50 = vsub.f32 %v1592_v7, %v564_v41  ;;  %v572_v36 = vld [vmem:[#allocation2 + $0x48] sm:$0xff] }
 0x10b   : > { %548 = vadd.xlane.f32.xlu1 %v547_v22  ;;  %v555_v29 = vadd.f32 %v477_v1, %v476_v28  ;;  %v600_v26 = vmul.f32 %v2028_v33, %v579_v13  ;;  %v681_v45 = vmul.f32 %v579_v13, %v579_v13  ;;  %v581_v53 = vsub.f32 %v2029_v37, %v565_v24  ;;  %v574_v22 = vld [vmem:[#allocation2 + $0x58] sm:$0xff]  ;;  %v576_v28 = vld [vmem:[#allocation2 + $0x68] sm:$0xff] }
 0x10c   : > { %v552_v14 = vadd.f32 %v551_v20, %v475_v52  ;;  %v601_v51 = vmul.f32 %v2028_v33, %v580_v50  ;;  %v682_v57 = vmul.f32 %v580_v50, %v580_v50  ;;  %v582_v21 = vsub.f32 %v1590_v2, %v566_v62 }
 0x10d   : > { %v556_v55 = vadd.f32 %v555_v29, %v478_v32  ;;  %v616_v58 = vadd.f32 %v600_v26, %v563_v56  ;;  %v1737_v8 = vmul.f32 %v2030_v15, %v681_v45  ;;  %v602_v7 = vmul.f32 %v2028_v33, %v581_v53 }
 0x10e   : > { %553 = vadd.xlane.f32.xlu0 %v552_v14  ;;  %v617_v0 = vadd.f32 %v601_v51, %v564_v41  ;;  %v1741_v59 = vmul.f32 %v2030_v15, %v682_v57  ;;  %v683_v48 = vmul.f32 %v581_v53, %v581_v53  ;;  %v603_v54 = vmul.f32 %v2028_v33, %v582_v21 }
 0x10f   : > { %v557_v2 = vadd.f32 %v556_v55, %v479_v4  ;;  %633 = vst.msk [vmem:[#allocation2] sm:$0xff] %vm632_vm1, %v616_v58  ;;  %v618_v11 = vadd.f32 %v602_v7, %v565_v24  ;;  %v684_v31 = vmul.f32 %v582_v21, %v582_v21  ;;  %v583_v10 = vsub.f32 %v1608_v16, %v567_v44  ;;  %v577_v58 = vld [vmem:[#allocation2 + $0x70] sm:$0xff]  ;;  %v578_v7 = vld [vmem:[#allocation2 + $0x78] sm:$0xff] }
 0x110   : > { %634 = vst.msk [vmem:[#allocation2 + $0x8] sm:$0xff] %vm632_vm1, %v617_v0  ;;  %v1748_v38 = vmul.f32 %v2030_v15, %v683_v48  ;;  %v619_v34 = vadd.f32 %v603_v54, %v566_v62  ;;  %v584_v56 = vsub.f32 %v1602_v27, %v568_v46  ;;  %v585_v39 = vsub.f32 %v1618_v5, %v569_v9  ;;  %v571_v5 = vld [vmem:[#allocation2 + $0x40] sm:$0xff] }
 0x111   : > { %558 = vadd.xlane.f32.xlu1 %v557_v2  ;;  %635 = vst.msk [vmem:[#allocation2 + $0x10] sm:$0xff] %vm632_vm1, %v618_v11  ;;  %v1754_v63 = vmul.f32 %v2030_v15, %v684_v31  ;;  %v604_v18 = vmul.f32 %v2028_v33, %v583_v10  ;;  %v685_v43 = vmul.f32 %v583_v10, %v583_v10 }
 0x112   : > { %v586_v16 = vsub.f32 %v1614_v3, %v570_v25  ;;  %636 = vst.msk [vmem:[#allocation2 + $0x18] sm:$0xff] %vm632_vm1, %v619_v34  ;;  %v605_v40 = vmul.f32 %v2028_v33, %v584_v56  ;;  %v686_v41 = vmul.f32 %v584_v56, %v584_v56  ;;  %v606_v27 = vmul.f32 %v2028_v33, %v585_v39  ;;  %v575_v3 = vld [vmem:[#allocation2 + $0x60] sm:$0xff] }
 0x113   : > { %v687_v52 = vmul.f32 %v585_v39, %v585_v39  ;;  %v620_v19 = vadd.f32 %v604_v18, %v567_v44  ;;  %v1762_v47 = vmul.f32 %v2030_v15, %v685_v43  ;;  %v587_v50 = vsub.f32 %v1632_v35, %v571_v5 }
 0x114   : > { %v607_v60 = vmul.f32 %v2028_v33, %v586_v16  ;;  %v688_v24 = vmul.f32 %v586_v16, %v586_v16  ;;  %v621_v1 = vadd.f32 %v605_v40, %v568_v46  ;;  %v1766_v13 = vmul.f32 %v2030_v15, %v686_v41 }
 0x115   : > { %v622_v62 = vadd.f32 %v606_v27, %v569_v9  ;;  %v1769_v20 = vmul.f32 %v2030_v15, %v687_v52  ;;  %637 = vst.msk [vmem:[#allocation2 + $0x20] sm:$0xff] %vm632_vm1, %v620_v19  ;;  %v588_v29 = vsub.f32 %v1630_v42, %v572_v36  ;;  %v589_v26 = vsub.f32 %v1648_v12, %v573_v23  ;;  %v651_v19 = vld [vmem:[#allocation3 + $0x10] sm:$0xff] }
 0x116   : > { %v623_v32 = vadd.f32 %v607_v60, %v570_v25  ;;  %v1773_v4 = vmul.f32 %v2030_v15, %v688_v24  ;;  %638 = vst.msk [vmem:[#allocation2 + $0x28] sm:$0xff] %vm632_vm1, %v621_v1  ;;  %v590_v45 = vsub.f32 %v1642_v6, %v574_v22  ;;  %v591_v37 = vsub.f32 %v1662_v17, %v575_v3  ;;  %v652_v1 = vld [vmem:[#allocation3 + $0x18] sm:$0xff] }
 0x117   : > { %639 = vst.msk [vmem:[#allocation2 + $0x30] sm:$0xff] %vm632_vm1, %v622_v62  ;;  %v592_v53 = vsub.f32 %v1658_v49, %v576_v28  ;;  %v608_v14 = vmul.f32 %v2028_v33, %v587_v50  ;;  %v689_v51 = vmul.f32 %v587_v50, %v587_v50  ;;  %v609_v35 = vmul.f32 %v2028_v33, %v588_v29  ;;  %v653_v50 = vld [vmem:[#allocation3 + $0x20] sm:$0xff] }
 0x118   : > { %640 = vst.msk [vmem:[#allocation2 + $0x38] sm:$0xff] %vm632_vm1, %v623_v32  ;;  %v690_v42 = vmul.f32 %v588_v29, %v588_v29  ;;  %v610_v57 = vmul.f32 %v2028_v33, %v589_v26  ;;  %v691_v21 = vmul.f32 %v589_v26, %v589_v26  ;;  %v611_v44 = vmul.f32 %v2028_v33, %v590_v45 }
 0x119   : > { %v692_v12 = vmul.f32 %v590_v45, %v590_v45  ;;  %v624_v55 = vadd.f32 %v608_v14, %v571_v5  ;;  %v1789_v6 = vmul.f32 %v2030_v15, %v689_v51  ;;  %v625_v17 = vadd.f32 %v609_v35, %v572_v36  ;;  %v649_v5 = vld [vmem:[#allocation3] sm:$0xff]  ;;  %v655_v51 = vld [vmem:[#allocation3 + $0x30] sm:$0xff] }
 0x11a   : > { %v1792_v49 = vmul.f32 %v2030_v15, %v690_v42  ;;  %v626_v46 = vadd.f32 %v610_v57, %v573_v23  ;;  %v1795_v9 = vmul.f32 %v2030_v15, %v691_v21  ;;  %v627_v0 = vadd.f32 %v611_v44, %v574_v22  ;;  %v650_v23 = vld [vmem:[#allocation3 + $0x8] sm:$0xff]  ;;  %v656_v57 = vld [vmem:[#allocation3 + $0x38] sm:$0xff] }
 0x11b   : > { %v1798_v48 = vmul.f32 %v2030_v15, %v692_v12  ;;  %641 = vst.msk [vmem:[#allocation2 + $0x40] sm:$0xff] %vm632_vm1, %v624_v55  ;;  %642 = vst.msk [vmem:[#allocation2 + $0x48] sm:$0xff] %vm632_vm1, %v625_v17  ;;  %v612_v54 = vmul.f32 %v2028_v33, %v591_v37  ;;  %v693_v25 = vmul.f32 %v591_v37, %v591_v37  ;;  %v654_v37 = vld [vmem:[#allocation3 + $0x28] sm:$0xff]  ;;  %v657_v12 = vld [vmem:[#allocation3 + $0x40] sm:$0xff] }
 0x11c   : > { %v613_v2 = vmul.f32 %v2028_v33, %v592_v53  ;;  %v694_v11 = vmul.f32 %v592_v53, %v592_v53  ;;  %643 = vst.msk [vmem:[#allocation2 + $0x50] sm:$0xff] %vm632_vm1, %v626_v46  ;;  %644 = vst.msk [vmem:[#allocation2 + $0x58] sm:$0xff] %vm632_vm1, %v627_v0  ;;  %v593_v31 = vsub.f32 %v1674_v61, %v577_v58  ;;  %v659_v46 = vld [vmem:[#allocation3 + $0x50] sm:$0xff] }
 0x11d   : > { %v594_v10 = vsub.f32 %v1672_v30, %v578_v7  ;;  %v628_v34 = vadd.f32 %v612_v54, %v575_v3  ;;  %v1809_v56 = vmul.f32 %v2030_v15, %v693_v25 }
 0x11e   : > { %v629_v39 = vadd.f32 %v613_v2, %v576_v28  ;;  %v1812_v18 = vmul.f32 %v2030_v15, %v694_v11  ;;  %v614_v43 = vmul.f32 %v2028_v33, %v593_v31  ;;  %v695_v16 = vmul.f32 %v593_v31, %v593_v31  ;;  %v660_v2 = vld [vmem:[#allocation3 + $0x58] sm:$0xff] }
 0x11f   : > { %v615_v40 = vmul.f32 %v2028_v33, %v594_v10  ;;  %v696_v41 = vmul.f32 %v594_v10, %v594_v10  ;;  %645 = vst.msk [vmem:[#allocation2 + $0x60] sm:$0xff] %vm632_vm1, %v628_v34  ;;  %v661_v10 = vld [vmem:[#allocation3 + $0x60] sm:$0xff] }
 0x120   : > { %646 = vst.msk [vmem:[#allocation2 + $0x68] sm:$0xff] %vm632_vm1, %v629_v39  ;;  %v630_v61 = vadd.f32 %v614_v43, %v577_v58  ;;  %v1819_v30 = vmul.f32 %v2030_v15, %v695_v16  ;;  %v658_v58 = vld [vmem:[#allocation3 + $0x48] sm:$0xff] }
 0x121   : > { %v631_v27 = vadd.f32 %v615_v40, %v578_v7  ;;  %v1822_v52 = vmul.f32 %v2030_v15, %v696_v41  ;;  %v662_v39 = vld [vmem:[#allocation3 + $0x68] sm:$0xff]  ;;  %v663_v41 = vld [vmem:[#allocation3 + $0x70] sm:$0xff] }
 0x122   : > { %647 = vst.msk [vmem:[#allocation2 + $0x70] sm:$0xff] %vm632_vm1, %v630_v61 }
 0x123   : > { %648 = vst.msk [vmem:[#allocation2 + $0x78] sm:$0xff] %vm632_vm1, %v631_v27 }
 0x170   : > { %v484_v36 = vpop.xlane.xlu0 %483 }
 0x171   : > { %v665_v33 = vadd.f32 %v649_v5, %v484_v36  ;;  %v664_v5 = vld [vmem:[#allocation3 + $0x78] sm:$0xff] }
 0x173   : > { %v715_v60 = vadd.f32 %v1737_v8, %v665_v33 }
 0x174   : > { %v489_v24 = vpop.xlane.xlu1 %488  ;;  %v494_v22 = vpop.xlane.xlu0 %493 }
 0x175   : > { %731 = vst.msk [vmem:[#allocation3] sm:$0xff] %vm632_vm1, %v715_v60  ;;  %v666_v3 = vadd.f32 %v650_v23, %v489_v24  ;;  %v667_v28 = vadd.f32 %v651_v19, %v494_v22 }
 0x177   : > { %v716_v15 = vadd.f32 %v1741_v59, %v666_v3  ;;  %v717_v62 = vadd.f32 %v1748_v38, %v667_v28 }
 0x178   : > { %v499_v32 = vpop.xlane.xlu1 %498 }
 0x179   : > { %732 = vst.msk [vmem:[#allocation3 + $0x8] sm:$0xff] %vm632_vm1, %v716_v15  ;;  %733 = vst.msk [vmem:[#allocation3 + $0x10] sm:$0xff] %vm632_vm1, %v717_v62  ;;  %v668_v29 = vadd.f32 %v652_v1, %v499_v32 }
 0x17a   : > { %v504_v26 = vpop.xlane.xlu0 %503 }
 0x17b   : > { %v718_v8 = vadd.f32 %v1754_v63, %v668_v29  ;;  %v669_v45 = vadd.f32 %v653_v50, %v504_v26 }
 0x17d   : > { %734 = vst.msk [vmem:[#allocation3 + $0x18] sm:$0xff] %vm632_vm1, %v718_v8  ;;  %v719_v53 = vadd.f32 %v1762_v47, %v669_v45  ;;  %v509_v14 = vpop.xlane.xlu1 %508 }
 0x17e   : > { %v670_v59 = vadd.f32 %v654_v37, %v509_v14 }
 0x17f   : > { %735 = vst.msk [vmem:[#allocation3 + $0x20] sm:$0xff] %vm632_vm1, %v719_v53 }
 0x180   : > { %v720_v38 = vadd.f32 %v1766_v13, %v670_v59  ;;  %v514_v35 = vpop.xlane.xlu0 %513 }
 0x181   : > { %v671_v42 = vadd.f32 %v655_v51, %v514_v35 }
 0x182   : > { %736 = vst.msk [vmem:[#allocation3 + $0x28] sm:$0xff] %vm632_vm1, %v720_v38 }
 0x183   : > { %v721_v63 = vadd.f32 %v1769_v20, %v671_v42 }
 0x184   : > { %v519_v21 = vpop.xlane.xlu1 %518 }
 0x185   : > { %737 = vst.msk [vmem:[#allocation3 + $0x30] sm:$0xff] %vm632_vm1, %v721_v63  ;;  %v672_v44 = vadd.f32 %v656_v57, %v519_v21 }
 0x187   : > { %v722_v47 = vadd.f32 %v1773_v4, %v672_v44  ;;  %v524_v55 = vpop.xlane.xlu0 %523 }
 0x188   : > { %v673_v17 = vadd.f32 %v657_v12, %v524_v55 }
 0x189   : > { %738 = vst.msk [vmem:[#allocation3 + $0x38] sm:$0xff] %vm632_vm1, %v722_v47 }
 0x18a   : > { %v723_v13 = vadd.f32 %v1789_v6, %v673_v17  ;;  %v529_v7 = vpop.xlane.xlu1 %528 }
 0x18b   : > { %v674_v0 = vadd.f32 %v658_v58, %v529_v7 }
 0x18c   : > { %739 = vst.msk [vmem:[#allocation3 + $0x40] sm:$0xff] %vm632_vm1, %v723_v13  ;;  %v534_v20 = vpop.xlane.xlu0 %533 }
 0x18d   : > { %v724_v54 = vadd.f32 %v1792_v49, %v674_v0  ;;  %v675_v25 = vadd.f32 %v659_v46, %v534_v20 }
 0x18f   : > { %740 = vst.msk [vmem:[#allocation3 + $0x48] sm:$0xff] %vm632_vm1, %v724_v54  ;;  %v725_v4 = vadd.f32 %v1795_v9, %v675_v25  ;;  %v539_v11 = vpop.xlane.xlu1 %538 }
 0x190   : > { %v676_v31 = vadd.f32 %v660_v2, %v539_v11 }
 0x191   : > { %741 = vst.msk [vmem:[#allocation3 + $0x50] sm:$0xff] %vm632_vm1, %v725_v4 }
 0x192   : > { %v726_v6 = vadd.f32 %v1798_v48, %v676_v31  ;;  %v544_v34 = vpop.xlane.xlu0 %543 }
 0x193   : > { %v677_v43 = vadd.f32 %v661_v10, %v544_v34 }
 0x194   : > { %742 = vst.msk [vmem:[#allocation3 + $0x58] sm:$0xff] %vm632_vm1, %v726_v6  ;;  %v549_v16 = vpop.xlane.xlu1 %548 }
 0x195   : > { %v727_v49 = vadd.f32 %v1809_v56, %v677_v43  ;;  %v678_v40 = vadd.f32 %v662_v39, %v549_v16 }
 0x197   : > { %743 = vst.msk [vmem:[#allocation3 + $0x60] sm:$0xff] %vm632_vm1, %v727_v49  ;;  %v728_v9 = vadd.f32 %v1812_v18, %v678_v40  ;;  %v554_v61 = vpop.xlane.xlu0 %553 }
 0x198   : > { %v679_v27 = vadd.f32 %v663_v41, %v554_v61 }
 0x199   : > { %744 = vst.msk [vmem:[#allocation3 + $0x68] sm:$0xff] %vm632_vm1, %v728_v9 }
 0x19a   : > { %v729_v48 = vadd.f32 %v1819_v30, %v679_v27  ;;  %v559_v36 = vpop.xlane.xlu1 %558 }
 0x19b   : > { %v680_v33 = vadd.f32 %v664_v5, %v559_v36  ;;  %750 = sbr.rel (%p975_p7) target bundleno = 561 (0x231), region = 36 }
 0x19c   : > { %745 = vst.msk [vmem:[#allocation3 + $0x70] sm:$0xff] %vm632_vm1, %v729_v48 }
 0x19d   : > { %v730_v23 = vadd.f32 %v1822_v52, %v680_v33 }
 0x19f   : > { %746 = vst.msk [vmem:[#allocation3 + $0x78] sm:$0xff] %vm632_vm1, %v730_v23 }
 0x1a0   : > { %v785_v56 = vld [vmem:[#allocation3 + $0x10] sm:$0xff]  ;;  %v783_v18 = vld [vmem:[#allocation3] sm:$0xff]  ;;  %v786_v30 = vld [vmem:[#allocation3 + $0x18] sm:$0xff]  ;;  %vm863_vm2 = vcmask 15368  }
 0x1a1   : > { %819 = vrot.lane.b32.xlu1 %v785_v56, %s1160_s18  ;;  %815 = vrot.lane.b32.xlu0 %v783_v18, %s1160_s18  ;;  %v784_v19 = vld [vmem:[#allocation3 + $0x8] sm:$0xff]  ;;  %v787_v60 = vld [vmem:[#allocation3 + $0x20] sm:$0xff]  ;;  %v753_v24 = vld [vmem:[#allocation2 + $0x10] sm:$0xff] }
 0x1a2   : > { %v788_v52 = vld [vmem:[#allocation3 + $0x28] sm:$0xff]  ;;  %v751_v22 = vld [vmem:[#allocation2] sm:$0xff]  ;;  %769 = vst.msk [vmem:[%s1270_s4 + $0x10] sm:$0xff] %vm632_vm1, %v753_v24  ;;  %v754_v3 = vld [vmem:[#allocation2 + $0x18] sm:$0xff] }
 0x1a3   : > { %767 = vst.msk [vmem:[%s1270_s4] sm:$0xff] %vm632_vm1, %v751_v22  ;;  %v752_v28 = vld [vmem:[#allocation2 + $0x8] sm:$0xff]  ;;  %770 = vst.msk [vmem:[%s1270_s4 + $0x18] sm:$0xff] %vm632_vm1, %v754_v3  ;;  %v755_v15 = vld [vmem:[#allocation2 + $0x20] sm:$0xff] }
 0x1a4   : > { %v756_v1 = vld [vmem:[#allocation2 + $0x28] sm:$0xff]  ;;  %768 = vst.msk [vmem:[%s1270_s4 + $0x8] sm:$0xff] %vm632_vm1, %v752_v28  ;;  %v758_v62 = vld [vmem:[#allocation2 + $0x38] sm:$0xff]  ;;  %v757_v32 = vld [vmem:[#allocation2 + $0x30] sm:$0xff] }
 0x1a5   : > { %821 = vrot.lane.b32.xlu1 %v786_v30, %s1160_s18  ;;  %817 = vrot.lane.b32.xlu0 %v784_v19, %s1160_s18  ;;  %772 = vst.msk [vmem:[%s1270_s4 + $0x28] sm:$0xff] %vm632_vm1, %v756_v1  ;;  %771 = vst.msk [vmem:[%s1270_s4 + $0x20] sm:$0xff] %vm632_vm1, %v755_v15  ;;  %v760_v50 = vld [vmem:[#allocation2 + $0x48] sm:$0xff]  ;;  %v759_v29 = vld [vmem:[#allocation2 + $0x40] sm:$0xff] }
 0x1a6   : > { %774 = vst.msk [vmem:[%s1270_s4 + $0x38] sm:$0xff] %vm632_vm1, %v758_v62  ;;  %773 = vst.msk [vmem:[%s1270_s4 + $0x30] sm:$0xff] %vm632_vm1, %v757_v32  ;;  %v762_v26 = vld [vmem:[#allocation2 + $0x58] sm:$0xff]  ;;  %v761_v45 = vld [vmem:[#allocation2 + $0x50] sm:$0xff] }
 0x1a7   : > { %v790_v8 = vld [vmem:[#allocation3 + $0x38] sm:$0xff]  ;;  %776 = vst.msk [vmem:[%s1270_s4 + $0x48] sm:$0xff] %vm632_vm1, %v760_v50  ;;  %775 = vst.msk [vmem:[%s1270_s4 + $0x40] sm:$0xff] %vm632_vm1, %v759_v29  ;;  %v789_v37 = vld [vmem:[#allocation3 + $0x30] sm:$0xff] }
 0x1a8   : > { %778 = vst.msk [vmem:[%s1270_s4 + $0x58] sm:$0xff] %vm632_vm1, %v762_v26  ;;  %777 = vst.msk [vmem:[%s1270_s4 + $0x50] sm:$0xff] %vm632_vm1, %v761_v45  ;;  %v764_v53 = vld [vmem:[#allocation2 + $0x68] sm:$0xff]  ;;  %v763_v14 = vld [vmem:[#allocation2 + $0x60] sm:$0xff] }
 0x1a9   : > { %825 = vrot.lane.b32.xlu1 %v788_v52, %s1160_s18  ;;  %823 = vrot.lane.b32.xlu0 %v787_v60, %s1160_s18  ;;  %780 = vst.msk [vmem:[%s1270_s4 + $0x68] sm:$0xff] %vm632_vm1, %v764_v53  ;;  %779 = vst.msk [vmem:[%s1270_s4 + $0x60] sm:$0xff] %vm632_vm1, %v763_v14  ;;  %v792_v59 = vld [vmem:[#allocation3 + $0x48] sm:$0xff]  ;;  %v791_v51 = vld [vmem:[#allocation3 + $0x40] sm:$0xff] }
 0x1aa   : > { %v766_v38 = vld [vmem:[#allocation2 + $0x78] sm:$0xff]  ;;  %v765_v35 = vld [vmem:[#allocation2 + $0x70] sm:$0xff]  ;;  %v796_v63 = vld [vmem:[#allocation3 + $0x68] sm:$0xff] }
 0x1ab   : > { %782 = vst.msk [vmem:[%s1270_s4 + $0x78] sm:$0xff] %vm632_vm1, %v766_v38  ;;  %781 = vst.msk [vmem:[%s1270_s4 + $0x70] sm:$0xff] %vm632_vm1, %v765_v35  ;;  %v794_v42 = vld [vmem:[#allocation3 + $0x58] sm:$0xff]  ;;  %v793_v57 = vld [vmem:[#allocation3 + $0x50] sm:$0xff] }
 0x1ac   : > { %v795_v21 = vld [vmem:[#allocation3 + $0x60] sm:$0xff]  ;;  %v798_v44 = vld [vmem:[#allocation3 + $0x78] sm:$0xff]  ;;  %v797_v12 = vld [vmem:[#allocation3 + $0x70] sm:$0xff] }
 0x1ad   : > { %829 = vrot.lane.b32.xlu1 %v790_v8, %s1160_s18  ;;  %827 = vrot.lane.b32.xlu0 %v789_v37, %s1160_s18 }
 0x1b1   : > { %833 = vrot.lane.b32.xlu1 %v792_v59, %s1160_s18  ;;  %831 = vrot.lane.b32.xlu0 %v791_v51, %s1160_s18 }
 0x1b5   : > { %837 = vrot.lane.b32.xlu1 %v794_v42, %s1160_s18  ;;  %835 = vrot.lane.b32.xlu0 %v793_v57, %s1160_s18 }
 0x1b9   : > { %841 = vrot.lane.b32.xlu1 %v796_v63, %s1160_s18  ;;  %839 = vrot.lane.b32.xlu0 %v795_v21, %s1160_s18 }
 0x1bd   : > { %845 = vrot.lane.b32.xlu1 %v798_v44, %s1160_s18  ;;  %843 = vrot.lane.b32.xlu0 %v797_v12, %s1160_s18 }
 0x213   : > { %v820_v47 = vpop.permute.xlu1 %819  ;;  %v816_v55 = vpop.permute.xlu0 %815 }
 0x214   : > { %866 = vst.msk [vmem:[%s1270_s4 + $0x10] sm:$0xff] %vm863_vm2, %v820_v47  ;;  %864 = vst.msk [vmem:[%s1270_s4] sm:$0xff] %vm863_vm2, %v816_v55 }
 0x217   : > { %v822_v17 = vpop.permute.xlu1 %821  ;;  %v818_v58 = vpop.permute.xlu0 %817 }
 0x218   : > { %867 = vst.msk [vmem:[%s1270_s4 + $0x18] sm:$0xff] %vm863_vm2, %v822_v17  ;;  %865 = vst.msk [vmem:[%s1270_s4 + $0x8] sm:$0xff] %vm863_vm2, %v818_v58 }
 0x21b   : > { %v826_v13 = vpop.permute.xlu1 %825  ;;  %v824_v7 = vpop.permute.xlu0 %823 }
 0x21c   : > { %869 = vst.msk [vmem:[%s1270_s4 + $0x28] sm:$0xff] %vm863_vm2, %v826_v13  ;;  %868 = vst.msk [vmem:[%s1270_s4 + $0x20] sm:$0xff] %vm863_vm2, %v824_v7 }
 0x21f   : > { %v830_v46 = vpop.permute.xlu1 %829  ;;  %v828_v0 = vpop.permute.xlu0 %827 }
 0x220   : > { %871 = vst.msk [vmem:[%s1270_s4 + $0x38] sm:$0xff] %vm863_vm2, %v830_v46  ;;  %870 = vst.msk [vmem:[%s1270_s4 + $0x30] sm:$0xff] %vm863_vm2, %v828_v0 }
 0x223   : > { %v834_v20 = vpop.permute.xlu1 %833  ;;  %v832_v54 = vpop.permute.xlu0 %831 }
 0x224   : > { %873 = vst.msk [vmem:[%s1270_s4 + $0x48] sm:$0xff] %vm863_vm2, %v834_v20  ;;  %872 = vst.msk [vmem:[%s1270_s4 + $0x40] sm:$0xff] %vm863_vm2, %v832_v54 }
 0x227   : > { %v838_v25 = vpop.permute.xlu1 %837  ;;  %v836_v2 = vpop.permute.xlu0 %835 }
 0x228   : > { %875 = vst.msk [vmem:[%s1270_s4 + $0x58] sm:$0xff] %vm863_vm2, %v838_v25  ;;  %874 = vst.msk [vmem:[%s1270_s4 + $0x50] sm:$0xff] %vm863_vm2, %v836_v2 }
 0x22b   : > { %v842_v4 = vpop.permute.xlu1 %841  ;;  %v840_v11 = vpop.permute.xlu0 %839 }
 0x22c   : > { %877 = vst.msk [vmem:[%s1270_s4 + $0x68] sm:$0xff] %vm863_vm2, %v842_v4  ;;  %876 = vst.msk [vmem:[%s1270_s4 + $0x60] sm:$0xff] %vm863_vm2, %v840_v11 }
 0x22f   : > { %v846_v31 = vpop.permute.xlu1 %845  ;;  %v844_v10 = vpop.permute.xlu0 %843 }
 0x230   : > { %879 = vst.msk [vmem:[%s1270_s4 + $0x78] sm:$0xff] %vm863_vm2, %v846_v31  ;;  %878 = vst.msk [vmem:[%s1270_s4 + $0x70] sm:$0xff] %vm863_vm2, %v844_v10 }
 0x231 PF: > { %s14_s13 = sadd.s32 1, %s1153_s13   ;;  %s2031_s6 = smov %s1129_s7 }
 0x232   : > { %p11_p11 = scmp.ge.s32.totalorder %s14_s13, 6   ;;  %s2032_s7 = smov %s1133_s8 }
 0x233   : > { %s2033_s8 = smov %s1238_s26  ;;  %s2034_s9 = smov %s1145_s11 }
 0x234   : > { %s2035_s10 = smov %s1149_s12  ;;  %s2036_s11 = smov %s2039_s15 }
 0x235   : > { %s2037_s12 = smov %s2043_s16  ;;  %13 = sbr.rel (!%p11_p11) target bundleno = 5 (0x5), region = 72 }
 0x23a   :  { %901 = vsyncpa [#allocation5], 1 }
 0x23b   :  { %903 = vsyncpa [#allocation5 + $0x1], 1 }

</bundles_post_ra>
